<compile_context>
chip_gen: v6e
topology: v6e:2x2x1
jax: 0.10.0
libtpu: 0.0.40
codegen_flags: <defaults>
</compile_context>

<pallas_src>
import functools
import numpy as np

import jax
import jax.numpy as jnp
from jax import lax
from jax.experimental import pallas as pl
from jax.experimental.pallas import tpu as pltpu

LOG2 = float(np.log(2.0))


def _round_up(x: int, m: int) -> int:
    return (x + m - 1) // m * m


def _shifted_softplus(x):
    # ln(1 + exp(x)) - ln(2), numerically stable.
    return jnp.logaddexp(x, 0.0) - LOG2


def _message_sum_kernel(
    # scalar-prefetch (SMEM)
    eblk_off_ref,   # [grid_n] int32: first edge block for node tile ni
    eblk_cnt_ref,   # [grid_n] int32: number of edge blocks for node tile ni
    # tiled inputs (VMEM)
    x_ref,          # [TE, dx]          bf16: [sender || edge_state], zero padded
    sc_ref,         # [TE, 1]           f32 precomputed soft-cutoff per edge
    recv_row_ref,   # [1, TE]           int32 receiver idx (sorted; n_pad = pad)
    recv_col_ref,   # [TE, 1]           int32 same indices, column orientation
    ntab_ref,       # [TN, Dn_pad]      bf16 receiver-node features, this tile
    w1_ref,         # [dx, Dh_tot]      bf16 fused first layer (sender+edge)
    b1_ref,         # [1, Dh_tot]       f32
    w1r_ref,        # [Dn_pad, Dh_tot]  bf16 receiver rows of node-branch W1
    w2_ref,         # [Dh_tot, 2*Do]    bf16 fused second layer (node | edge)
    b2_ref,         # [1, 2*Do]         f32
    # output
    out_ref,        # [TN, Do]          f32 per-node message sum
    *, include_receiver: bool,
):
    f32 = jnp.float32
    ni = pl.program_id(0)
    ei = pl.program_id(1)
    tn, do_pad = out_ref.shape
    te = x_ref.shape[0]
    mxu_dt = w1_ref.dtype

    @pl.when(ei == 0)
    def _():
        out_ref[...] = jnp.zeros_like(out_ref)

    # Skip edge blocks that contain no receivers belonging to this node tile.
    @pl.when(ei < eblk_cnt_ref[ni])
    def _():
        base = ni * tn
        # scatter-orientation one-hot [TN, TE] and gather-orientation [TE, TN]
        row_ids = base + lax.broadcasted_iota(jnp.int32, (tn, te), 0)
        onehot_s = (row_ids == recv_row_ref[...]).astype(mxu_dt)
        col_ids = base + lax.broadcasted_iota(jnp.int32, (te, tn), 1)
        onehot_g = (col_ids == recv_col_ref[...]).astype(mxu_dt)

        # fused first layer: sender + edge branches in one block-diag matmul
        pre = jnp.dot(x_ref[...], w1_ref[...], preferred_element_type=f32)
        pre = pre + b1_ref[...]
        if include_receiver:
            # in-kernel receiver gather: receivers are sorted, so they live in
            # the resident node tile; edges straddling the tile boundary get
            # zero features here but are masked out by onehot_s below.
            r = jnp.dot(onehot_g, ntab_ref[...], preferred_element_type=f32)
            pre = pre + jnp.dot(r.astype(mxu_dt), w1r_ref[...],
                                preferred_element_type=f32)
        h = _shifted_softplus(pre)                       # [TE, Dh_tot] f32

        # fused second layer: [node message | edge gate]
        out2 = jnp.dot(h.astype(mxu_dt), w2_ref[...],
                       preferred_element_type=f32) + b2_ref[...]
        node_msg = out2[:, :do_pad]                      # lane-aligned split
        gates = out2[:, do_pad:]
        messages = node_msg * (gates * sc_ref[...])      # [TE, Do] f32

        # scatter-add onto receivers of this node tile (one-hot MXU matmul).
        # Note: messages are rounded to bf16 as MXU operands; accumulation f32.
        out_ref[...] += jnp.dot(onehot_s, messages.astype(mxu_dt),
                                preferred_element_type=f32)


def message_sum_pallas(node_state, edges, edge_state, edges_distance, params, *,
                       cutoff, include_receiver, receiver_nodes=None,
                       tile_e=1024, tile_n=256, mxu_dtype=jnp.bfloat16):
    node_state = node_state.astype(jnp.float32)
    edge_state = edge_state.astype(jnp.float32)
    edges_distance = edges_distance.astype(jnp.float32)
    recv_table = (receiver_nodes.astype(jnp.float32)
                  if receiver_nodes is not None else node_state)

    n_out, node_size = recv_table.shape
    n_edges, edge_size = edge_state.shape
    input_size = node_size * 2 if include_receiver else node_size

    # ---- host-side graph preprocessing (structure must be concrete) ---------
    # TODO(synk): make the wrapper jittable by taking a static bound on
    # edge-blocks-per-node-tile instead of deriving it from the data.
    edges_np = np.asarray(jax.device_get(edges)).astype(np.int32)
    order_np = np.argsort(edges_np[:, 1], kind="stable")
    send_idx = jnp.asarray(edges_np[order_np, 0])
    recv_np = edges_np[order_np, 1]
    order = jnp.asarray(order_np)

    edge_state_s = edge_state[order]
    dist_s = edges_distance[order]
    sender_feat = node_state[send_idx]   # TODO(synk): in-kernel DMA gather

    # ---- lane-dense padded feature geometry (multiples of 128) --------------
    dn_pad = _round_up(node_size, 128)       # receiver-feature width
    din_pad = _round_up(input_size, 128)     # node-branch hidden width
    dh_pad = _round_up(node_size, 128)       # edge-branch hidden width
    do_pad = _round_up(node_size, 128)       # output width
    dh_tot = din_pad + dh_pad                # fused first-layer output width
    dx = _round_up(node_size + edge_size, 128)   # [sender || edge] input width

    # node tile: multiple of 8; prefer >= 2 node tiles so v7x's two TensorCores
    # both get work along the "parallel" axis.
    tn = min(tile_n, _round_up(n_out, 8))
    if _round_up(n_out, tn) // tn < 2 and n_out > 8:
        tn = _round_up((n_out + 1) // 2, 8)
    n_pad = _round_up(n_out, tn)
    grid_n = n_pad // tn

    te = min(tile_e, _round_up(max(n_edges, 1), 128))
    e_pad = _round_up(max(n_edges, 1), te)

    # per-node-tile edge-block ranges (edges sorted by receiver).
    eblk_off = np.zeros((grid_n,), np.int32)
    eblk_cnt = np.zeros((grid_n,), np.int32)
    for i in range(grid_n):
        lo = int(np.searchsorted(recv_np, i * tn, side="left"))
        hi = int(np.searchsorted(recv_np, (i + 1) * tn, side="left"))
        if hi > lo:
            eblk_off[i] = lo // te
            eblk_cnt[i] = (hi - 1) // te + 1 - lo // te
    max_blk = max(1, int(eblk_cnt.max()) if eblk_cnt.size else 1)

    # ---- pack activations ----------------------------------------------------
    x = jnp.zeros((e_pad, dx), jnp.float32)
    x = x.at[:n_edges, :node_size].set(sender_feat)
    x = x.at[:n_edges, node_size:node_size + edge_size].set(edge_state_s)
    x = x.astype(mxu_dtype)

    soft_cut = 1.0 - jax.nn.sigmoid(5.0 * (dist_s - (cutoff - 1.5)))
    sc = jnp.zeros((e_pad, 1), jnp.float32).at[:n_edges].set(soft_cut)

    recv_row = jnp.full((1, e_pad), n_pad, jnp.int32)   # sentinel never matches
    recv_row = recv_row.at[0, :n_edges].set(jnp.asarray(recv_np))
    recv_col = recv_row.reshape(e_pad, 1)

    ntab = jnp.zeros((n_pad, dn_pad), jnp.float32)
    ntab = ntab.at[:n_out, :node_size].set(recv_table)
    ntab = ntab.astype(mxu_dtype)

    # ---- pack weights: block-diagonal fused layers, zero padded --------------
    w1n, b1n = params["w1n"], params["b1n"]
    w1e, b1e = params["w1e"], params["b1e"]
    w2n, b2n = params["w2n"], params["b2n"]
    w2e, b2e = params["w2e"], params["b2e"]

    w1 = jnp.zeros((dx, dh_tot), jnp.float32)
    w1 = w1.at[:node_size, :input_size].set(w1n[:node_size, :])
    w1 = w1.at[node_size:node_size + edge_size,
               din_pad:din_pad + node_size].set(w1e)
    b1 = jnp.zeros((1, dh_tot), jnp.float32)
    b1 = b1.at[:, :input_size].set(b1n)
    b1 = b1.at[:, din_pad:din_pad + node_size].set(b1e)

    w1r = jnp.zeros((dn_pad, dh_tot), jnp.float32)
    if include_receiver:
        w1r = w1r.at[:node_size, :input_size].set(w1n[node_size:, :])

    w2 = jnp.zeros((dh_tot, 2 * do_pad), jnp.float32)
    w2 = w2.at[:input_size, :node_size].set(w2n)
    w2 = w2.at[din_pad:din_pad + node_size,
               do_pad:do_pad + node_size].set(w2e)
    b2 = jnp.zeros((1, 2 * do_pad), jnp.float32)
    b2 = b2.at[:, :node_size].set(b2n)
    b2 = b2.at[:, do_pad:do_pad + node_size].set(b2e)

    w1 = w1.astype(mxu_dtype)
    w1r = w1r.astype(mxu_dtype)
    w2 = w2.astype(mxu_dtype)

    # ---- grid / specs ---------------------------------------------------------
    def edge_blk(ni, ei, off, cnt):
        return (off[ni] + jnp.minimum(ei, jnp.maximum(cnt[ni], 1) - 1), 0)

    def edge_blk_row(ni, ei, off, cnt):
        return (0, off[ni] + jnp.minimum(ei, jnp.maximum(cnt[ni], 1) - 1))

    node_blk = lambda ni, ei, off, cnt: (ni, 0)
    const_blk = lambda ni, ei, off, cnt: (0, 0)

    in_specs = [
        pl.BlockSpec((te, dx), edge_blk),                 # x
        pl.BlockSpec((te, 1), edge_blk),                  # soft-cutoff
        pl.BlockSpec((1, te), edge_blk_row),              # recv (row layout)
        pl.BlockSpec((te, 1), edge_blk),                  # recv (col layout)
        pl.BlockSpec((tn, dn_pad), node_blk),             # receiver node table
        pl.BlockSpec((dx, dh_tot), const_blk),            # w1 (fused)
        pl.BlockSpec((1, dh_tot), const_blk),             # b1
        pl.BlockSpec((dn_pad, dh_tot), const_blk),        # w1 receiver rows
        pl.BlockSpec((dh_tot, 2 * do_pad), const_blk),    # w2 (fused)
        pl.BlockSpec((1, 2 * do_pad), const_blk),         # b2
    ]
    out_specs = pl.BlockSpec((tn, do_pad), lambda ni, ei, off, cnt: (ni, 0))

    visited = max(1, int(eblk_cnt.sum()) if eblk_cnt.size else 1)
    flops = 2 * visited * te * (dx * dh_tot + tn * dn_pad + dn_pad * dh_tot
                                + dh_tot * 2 * do_pad + tn * do_pad)
    transcendentals = 2 * visited * te * dh_tot
    bytes_accessed = (visited * te * (dx * 2 + 4 + 8)
                      + grid_n * tn * (dn_pad * 2 + do_pad * 4)
                      + 2 * (dx * dh_tot + dn_pad * dh_tot + dh_tot * 2 * do_pad))

    kernel = functools.partial(_message_sum_kernel,
                               include_receiver=include_receiver)

    out_padded = pl.pallas_call(
        kernel,
        out_shape=jax.ShapeDtypeStruct((n_pad, do_pad), jnp.float32),
        grid_spec=pltpu.PrefetchScalarGridSpec(
            num_scalar_prefetch=2,
            grid=(grid_n, max_blk),
            in_specs=in_specs,
            out_specs=out_specs,
        ),
        compiler_params=pltpu.CompilerParams(
            dimension_semantics=("parallel", "arbitrary"),
            # 48 MiB is safe on all of v5e/v6e (128 MiB VMEM) and v7x (64 MiB);
            # raise towards 64-100 MiB on v5e/v6e for larger tile_e.
            vmem_limit_bytes=48 * 1024 * 1024,
        ),
        cost_estimate=pl.CostEstimate(flops=int(flops),
                                      transcendentals=int(transcendentals),
                                      bytes_accessed=int(bytes_accessed)),
    )(jnp.asarray(eblk_off), jnp.asarray(eblk_cnt),
      x, sc, recv_row, recv_col, ntab, w1, b1, w1r, w2, b2)

    return out_padded[:n_out, :node_size]


def init_params(key, node_size, edge_size, include_receiver):
    input_size = node_size * 2 if include_receiver else node_size
    keys = jax.random.split(key, 8)

    def lin(kw, kb, fan_in, fan_out):
        bound = 1.0 / np.sqrt(fan_in)
        w = jax.random.uniform(kw, (fan_in, fan_out), jnp.float32, -bound, bound)
        b = jax.random.uniform(kb, (1, fan_out), jnp.float32, -bound, bound)
        return w, b

    w1n, b1n = lin(keys[0], keys[1], input_size, input_size)
    w2n, b2n = lin(keys[2], keys[3], input_size, node_size)
    w1e, b1e = lin(keys[4], keys[5], edge_size, node_size)
    w2e, b2e = lin(keys[6], keys[7], node_size, node_size)
    return dict(w1n=w1n, b1n=b1n, w2n=w2n, b2n=b2n,
                w1e=w1e, b1e=b1e, w2e=w2e, b2e=b2e)


def message_sum_reference(node_state, edges, edge_state, edges_distance,
                          params, *, cutoff, include_receiver, cast_dtype=None):
    """Pure-JAX reference.  If cast_dtype is given, matmul operands (and the
    final messages) are rounded through that dtype with f32 accumulation, to
    mirror the kernel's bf16-operand / f32-accumulate MXU path."""
    f32 = jnp.float32

    def c(a):
        return a.astype(cast_dtype).astype(f32) if cast_dtype is not None else a

    def mm(a, b):
        return jnp.dot(c(a), c(b), preferred_element_type=f32)

    senders = node_state[edges[:, 0]]
    if include_receiver:
        nodes = jnp.concatenate([senders, node_state[edges[:, 1]]], axis=1)
    else:
        nodes = senders

    h_e = _shifted_softplus(mm(edge_state, params["w1e"]) + params["b1e"])
    gates = mm(h_e, params["w2e"]) + params["b2e"]
    gates = gates * (1.0 - jax.nn.sigmoid(5.0 * (edges_distance - (cutoff - 1.5))))

    h_n = _shifted_softplus(mm(nodes, params["w1n"]) + params["b1n"])
    node_msg = mm(h_n, params["w2n"]) + params["b2n"]

    messages = c(node_msg * gates)
    out = jnp.zeros_like(node_state)
    return out.at[edges[:, 1]].add(messages)


if __name__ == "__main__":
    node_size = 32
    edge_size = 16
    num_nodes = 8
    num_edges = 16
    cutoff = 5.0
    include_receiver = True

    key = jax.random.PRNGKey(0)
    k_node, k_edge, k_dist, k_eidx, k_param = jax.random.split(key, 5)

    node_state = jax.random.normal(k_node, (num_nodes, node_size), jnp.float32)
    edge_state = jax.random.normal(k_edge, (num_edges, edge_size), jnp.float32)
    edges_distance = jax.random.uniform(k_dist, (num_edges, 1), jnp.float32, 0.5, 6.0)
    edges = jax.random.randint(k_eidx, (num_edges, 2), 0, num_nodes, jnp.int32)

    params = init_params(k_param, node_size, edge_size, include_receiver)

    out = message_sum_pallas(
        node_state, edges, edge_state, edges_distance, params,
        cutoff=cutoff, include_receiver=include_receiver,
    )
    out = jax.block_until_ready(out)
    assert out.shape == (num_nodes, node_size)

    # bf16-matched reference (same operand rounding as the kernel) -> tight check.
    ref_bf16 = message_sum_reference(
        node_state, edges, edge_state, edges_distance, params,
        cutoff=cutoff, include_receiver=include_receiver, cast_dtype=jnp.bfloat16,
    )
    np.testing.assert_allclose(np.asarray(out), np.asarray(ref_bf16),
                               rtol=5e-3, atol=5e-3)

    # Full-f32 reference -> loose sanity check on the overall bf16 error.
    ref_f32 = message_sum_reference(
        node_state, edges, edge_state, edges_distance, params,
        cutoff=cutoff, include_receiver=include_receiver,
    )
    np.testing.assert_allclose(np.asarray(out), np.asarray(ref_f32),
                               rtol=1e-1, atol=1e-1)

    print("KERNEL_OK")
</pallas_src>

<mosaic_0001>
module attributes {stable_mosaic.version = 11 : i64} {
  func.func @_message_sum_kernel(%arg0: i32, %arg1: i32, %arg2: memref<1xi32, #tpu.memory_space<smem>>, %arg3: memref<1xi32, #tpu.memory_space<smem>>, %arg4: memref<128x128xbf16, #tpu.memory_space<vmem>>, %arg5: memref<128x1xf32, #tpu.memory_space<vmem>>, %arg6: memref<1x128xi32, #tpu.memory_space<vmem>>, %arg7: memref<128x1xi32, #tpu.memory_space<vmem>>, %arg8: memref<8x128xbf16, #tpu.memory_space<vmem>>, %arg9: memref<128x256xbf16, #tpu.memory_space<vmem>>, %arg10: memref<1x256xf32, #tpu.memory_space<vmem>>, %arg11: memref<128x256xbf16, #tpu.memory_space<vmem>>, %arg12: memref<256x256xbf16, #tpu.memory_space<vmem>>, %arg13: memref<1x256xf32, #tpu.memory_space<vmem>>, %arg14: memref<8x128xf32, #tpu.memory_space<vmem>>) attributes {dimension_semantics = [#tpu.dimension_semantics<parallel>, #tpu.dimension_semantics<arbitrary>], iteration_bounds = array<i64: 1, 1>, scalar_prefetch = 2 : i64, scratch_operands = 0 : i64, tpu.core_type = #tpu.core_type<tc>, window_params = [{transform_indices = @transform_0, window_bounds = array<i64: 128, 128>}, {transform_indices = @transform_1, window_bounds = array<i64: 128, 1>}, {transform_indices = @transform_2, window_bounds = array<i64: 1, 128>}, {transform_indices = @transform_3, window_bounds = array<i64: 128, 1>}, {transform_indices = @transform_4, window_bounds = array<i64: 8, 128>}, {pipeline_mode = #tpu.pipeline_mode<synchronous>, transform_indices = @transform_5, window_bounds = array<i64: 128, 256>}, {pipeline_mode = #tpu.pipeline_mode<synchronous>, transform_indices = @transform_6, window_bounds = array<i64: 1, 256>}, {pipeline_mode = #tpu.pipeline_mode<synchronous>, transform_indices = @transform_7, window_bounds = array<i64: 128, 256>}, {pipeline_mode = #tpu.pipeline_mode<synchronous>, transform_indices = @transform_8, window_bounds = array<i64: 256, 256>}, {pipeline_mode = #tpu.pipeline_mode<synchronous>, transform_indices = @transform_9, window_bounds = array<i64: 1, 256>}, {transform_indices = @transform_10, window_bounds = array<i64: 8, 128>}]} {
    %c0_i32 = arith.constant 0 : i32
    %0 = arith.cmpi eq, %arg1, %c0_i32 : i32
    %1 = arith.extui %0 : i1 to i32
    %c0_i32_0 = arith.constant 0 : i32
    %2 = arith.cmpi ne, %1, %c0_i32_0 : i32
    scf.if %2 {
      %cst = arith.constant 0.000000e+00 : f32
      %8 = vector.broadcast %cst : f32 to vector<8x128xf32>
      %c0 = arith.constant 0 : index
      %c0_2 = arith.constant 0 : index
      %9 = vector.load %arg14[%c0, %c0_2] : memref<8x128xf32, #tpu.memory_space<vmem>>, vector<8x128xf32>
      tpu.vector_store %arg14[%c0, %c0_2], %8 {strides = array<i32>} : memref<8x128xf32, #tpu.memory_space<vmem>>, vector<8x128xf32>,
    } else {
    }
    %3 = arith.index_cast %arg0 : i32 to index
    %4 = memref.load %arg3[%3] : memref<1xi32, #tpu.memory_space<smem>>
    %5 = arith.cmpi slt, %arg1, %4 : i32
    %6 = arith.extui %5 : i1 to i32
    %c0_i32_1 = arith.constant 0 : i32
    %7 = arith.cmpi ne, %6, %c0_i32_1 : i32
    scf.if %7 {
      %c8_i32 = arith.constant 8 : i32
      %8 = arith.muli %arg0, %c8_i32 : i32
      %9 = tpu.iota {dimensions = array<i32: 0>} : vector<8x128xi32>
      %10 = vector.broadcast %8 : i32 to vector<8x128xi32>
      %11 = arith.addi %10, %9 : vector<8x128xi32>
      %c0 = arith.constant 0 : index
      %c0_2 = arith.constant 0 : index
      %12 = vector.load %arg6[%c0, %c0_2] : memref<1x128xi32, #tpu.memory_space<vmem>>, vector<1x128xi32>
      %13 = vector.broadcast %12 : vector<1x128xi32> to vector<8x128xi32>
      %14 = arith.cmpi eq, %11, %13 : vector<8x128xi32>
      %15 = arith.extui %14 : vector<8x128xi1> to vector<8x128xi32>
      %16 = arith.sitofp %15 : vector<8x128xi32> to vector<8x128xf32>
      %17 = arith.truncf %16 : vector<8x128xf32> to vector<8x128xbf16>
      %18 = tpu.iota {dimensions = array<i32: 1>} : vector<128x8xi32>
      %19 = vector.broadcast %8 : i32 to vector<128x8xi32>
      %20 = arith.addi %19, %18 : vector<128x8xi32>
      %c0_3 = arith.constant 0 : index
      %c0_4 = arith.constant 0 : index
      %21 = vector.load %arg7[%c0_3, %c0_4] : memref<128x1xi32, #tpu.memory_space<vmem>>, vector<128x1xi32>
      %22 = vector.broadcast %21 : vector<128x1xi32> to vector<128x8xi32>
      %23 = arith.cmpi eq, %20, %22 : vector<128x8xi32>
      %24 = arith.extui %23 : vector<128x8xi1> to vector<128x8xi32>
      %25 = arith.sitofp %24 : vector<128x8xi32> to vector<128x8xf32>
      %26 = arith.truncf %25 : vector<128x8xf32> to vector<128x8xbf16>
      %c0_5 = arith.constant 0 : index
      %c0_6 = arith.constant 0 : index
      %27 = vector.load %arg4[%c0_5, %c0_6] : memref<128x128xbf16, #tpu.memory_space<vmem>>, vector<128x128xbf16>
      %c0_7 = arith.constant 0 : index
      %c0_8 = arith.constant 0 : index
      %28 = vector.load %arg9[%c0_7, %c0_8] : memref<128x256xbf16, #tpu.memory_space<vmem>>, vector<128x256xbf16>
      %cst = arith.constant dense<0.000000e+00> : vector<128x256xf32>
      %29 = tpu.matmul %27, %28, %cst {dimension_numbers = #tpu.dot_dimension_numbers<[1], [0], [0], [1], [0, 0, 1, 1], [], []>} : vector<128x128xbf16>, vector<128x256xbf16>, vector<128x256xf32> -> vector<128x256xf32>
      %c0_9 = arith.constant 0 : index
      %c0_10 = arith.constant 0 : index
      %30 = vector.load %arg10[%c0_9, %c0_10] : memref<1x256xf32, #tpu.memory_space<vmem>>, vector<1x256xf32>
      %31 = vector.broadcast %30 : vector<1x256xf32> to vector<128x256xf32>
      %32 = arith.addf %29, %31 : vector<128x256xf32>
      %c0_11 = arith.constant 0 : index
      %c0_12 = arith.constant 0 : index
      %33 = vector.load %arg8[%c0_11, %c0_12] : memref<8x128xbf16, #tpu.memory_space<vmem>>, vector<8x128xbf16>
      %cst_13 = arith.constant dense<0.000000e+00> : vector<128x128xf32>
      %34 = tpu.matmul %26, %33, %cst_13 {dimension_numbers = #tpu.dot_dimension_numbers<[1], [0], [0], [1], [0, 0, 1, 1], [], []>} : vector<128x8xbf16>, vector<8x128xbf16>, vector<128x128xf32> -> vector<128x128xf32>
      %35 = arith.truncf %34 : vector<128x128xf32> to vector<128x128xbf16>
      %c0_14 = arith.constant 0 : index
      %c0_15 = arith.constant 0 : index
      %36 = vector.load %arg11[%c0_14, %c0_15] : memref<128x256xbf16, #tpu.memory_space<vmem>>, vector<128x256xbf16>
      %cst_16 = arith.constant dense<0.000000e+00> : vector<128x256xf32>
      %37 = tpu.matmul %35, %36, %cst_16 {dimension_numbers = #tpu.dot_dimension_numbers<[1], [0], [0], [1], [0, 0, 1, 1], [], []>} : vector<128x128xbf16>, vector<128x256xbf16>, vector<128x256xf32> -> vector<128x256xf32>
      %38 = arith.addf %32, %37 : vector<128x256xf32>
      %cst_17 = arith.constant 0.000000e+00 : f32
      %39 = vector.broadcast %cst_17 : f32 to vector<128x256xf32>
      %40 = arith.maximumf %38, %39 : vector<128x256xf32>
      %41 = vector.broadcast %cst_17 : f32 to vector<128x256xf32>
      %42 = arith.subf %38, %41 : vector<128x256xf32>
      %43 = arith.cmpf one, %42, %42 : vector<128x256xf32>
      %44 = vector.broadcast %cst_17 : f32 to vector<128x256xf32>
      %45 = arith.addf %38, %44 : vector<128x256xf32>
      %46 = math.absf %42 : vector<128x256xf32>
      %cst_18 = arith.constant 0.000000e+00 : f32
      %47 = vector.broadcast %cst_18 : f32 to vector<128x256xf32>
      %48 = arith.subf %47, %46 : vector<128x256xf32>
      %49 = math.exp %48 : vector<128x256xf32>
      %50 = math.log1p %49 : vector<128x256xf32>
      %51 = arith.addf %40, %50 : vector<128x256xf32>
      %52 = arith.select %43, %45, %51 : vector<128x256xi1>, vector<128x256xf32>
      %cst_19 = arith.constant 0.693147182 : f32
      %53 = vector.broadcast %cst_19 : f32 to vector<128x256xf32>
      %54 = arith.subf %52, %53 : vector<128x256xf32>
      %55 = arith.truncf %54 : vector<128x256xf32> to vector<128x256xbf16>
      %c0_20 = arith.constant 0 : index
      %c0_21 = arith.constant 0 : index
      %56 = vector.load %arg12[%c0_20, %c0_21] : memref<256x256xbf16, #tpu.memory_space<vmem>>, vector<256x256xbf16>
      %cst_22 = arith.constant dense<0.000000e+00> : vector<128x256xf32>
      %57 = tpu.matmul %55, %56, %cst_22 {dimension_numbers = #tpu.dot_dimension_numbers<[1], [0], [0], [1], [0, 0, 1, 1], [], []>} : vector<128x256xbf16>, vector<256x256xbf16>, vector<128x256xf32> -> vector<128x256xf32>
      %c0_23 = arith.constant 0 : index
      %c0_24 = arith.constant 0 : index
      %58 = vector.load %arg13[%c0_23, %c0_24] : memref<1x256xf32, #tpu.memory_space<vmem>>, vector<1x256xf32>
      %59 = vector.broadcast %58 : vector<1x256xf32> to vector<128x256xf32>
      %60 = arith.addf %57, %59 : vector<128x256xf32>
      %61 = vector.extract_strided_slice %60 {offsets = [0, 0], sizes = [128, 128], strides = [1, 1]} : vector<128x256xf32> to vector<128x128xf32>
      %62 = vector.extract_strided_slice %60 {offsets = [0, 128], sizes = [128, 128], strides = [1, 1]} : vector<128x256xf32> to vector<128x128xf32>
      %c0_25 = arith.constant 0 : index
      %c0_26 = arith.constant 0 : index
      %63 = vector.load %arg5[%c0_25, %c0_26] : memref<128x1xf32, #tpu.memory_space<vmem>>, vector<128x1xf32>
      %64 = vector.broadcast %63 : vector<128x1xf32> to vector<128x128xf32>
      %65 = arith.mulf %62, %64 : vector<128x128xf32>
      %66 = arith.mulf %61, %65 : vector<128x128xf32>
      %c0_27 = arith.constant 0 : index
      %c0_28 = arith.constant 0 : index
      %67 = vector.load %arg14[%c0_27, %c0_28] : memref<8x128xf32, #tpu.memory_space<vmem>>, vector<8x128xf32>
      %68 = arith.truncf %66 : vector<128x128xf32> to vector<128x128xbf16>
      %cst_29 = arith.constant dense<0.000000e+00> : vector<8x128xf32>
      %69 = tpu.matmul %17, %68, %cst_29 {dimension_numbers = #tpu.dot_dimension_numbers<[1], [0], [0], [1], [0, 0, 1, 1], [], []>} : vector<8x128xbf16>, vector<128x128xbf16>, vector<8x128xf32> -> vector<8x128xf32>
      %70 = arith.addf %67, %69 : vector<8x128xf32>
      %c0_30 = arith.constant 0 : index
      %c0_31 = arith.constant 0 : index
      %71 = vector.load %arg14[%c0_30, %c0_31] : memref<8x128xf32, #tpu.memory_space<vmem>>, vector<8x128xf32>
      tpu.vector_store %arg14[%c0_30, %c0_31], %70 {strides = array<i32>} : memref<8x128xf32, #tpu.memory_space<vmem>>, vector<8x128xf32>,
    } else {
    }
    return
  }
  func.func @transform_0(%arg0: i32, %arg1: i32, %arg2: memref<1xi32, #tpu.memory_space<smem>>, %arg3: memref<1xi32, #tpu.memory_space<smem>>) -> (i32, i32) {
    %0 = arith.index_cast %arg0 : i32 to index
    %1 = memref.load %arg2[%0] : memref<1xi32, #tpu.memory_space<smem>>
    %2 = arith.index_cast %arg0 : i32 to index
    %3 = memref.load %arg3[%2] : memref<1xi32, #tpu.memory_space<smem>>
    %c1_i32 = arith.constant 1 : i32
    %4 = arith.maxsi %3, %c1_i32 : i32
    %c1_i32_0 = arith.constant 1 : i32
    %5 = arith.subi %4, %c1_i32_0 : i32
    %6 = arith.minsi %arg1, %5 : i32
    %7 = arith.addi %1, %6 : i32
    %c0_i32 = arith.constant 0 : i32
    %c0_i32_1 = arith.constant 0 : i32
    return %7, %c0_i32 : i32, i32
  }
  func.func @transform_1(%arg0: i32, %arg1: i32, %arg2: memref<1xi32, #tpu.memory_space<smem>>, %arg3: memref<1xi32, #tpu.memory_space<smem>>) -> (i32, i32) {
    %0 = arith.index_cast %arg0 : i32 to index
    %1 = memref.load %arg2[%0] : memref<1xi32, #tpu.memory_space<smem>>
    %2 = arith.index_cast %arg0 : i32 to index
    %3 = memref.load %arg3[%2] : memref<1xi32, #tpu.memory_space<smem>>
    %c1_i32 = arith.constant 1 : i32
    %4 = arith.maxsi %3, %c1_i32 : i32
    %c1_i32_0 = arith.constant 1 : i32
    %5 = arith.subi %4, %c1_i32_0 : i32
    %6 = arith.minsi %arg1, %5 : i32
    %7 = arith.addi %1, %6 : i32
    %c0_i32 = arith.constant 0 : i32
    %c0_i32_1 = arith.constant 0 : i32
    return %7, %c0_i32 : i32, i32
  }
  func.func @transform_2(%arg0: i32, %arg1: i32, %arg2: memref<1xi32, #tpu.memory_space<smem>>, %arg3: memref<1xi32, #tpu.memory_space<smem>>) -> (i32, i32) {
    %0 = arith.index_cast %arg0 : i32 to index
    %1 = memref.load %arg2[%0] : memref<1xi32, #tpu.memory_space<smem>>
    %2 = arith.index_cast %arg0 : i32 to index
    %3 = memref.load %arg3[%2] : memref<1xi32, #tpu.memory_space<smem>>
    %c1_i32 = arith.constant 1 : i32
    %4 = arith.maxsi %3, %c1_i32 : i32
    %c1_i32_0 = arith.constant 1 : i32
    %5 = arith.subi %4, %c1_i32_0 : i32
    %6 = arith.minsi %arg1, %5 : i32
    %7 = arith.addi %1, %6 : i32
    %c0_i32 = arith.constant 0 : i32
    %c0_i32_1 = arith.constant 0 : i32
    return %c0_i32, %7 : i32, i32
  }
  func.func @transform_3(%arg0: i32, %arg1: i32, %arg2: memref<1xi32, #tpu.memory_space<smem>>, %arg3: memref<1xi32, #tpu.memory_space<smem>>) -> (i32, i32) {
    %0 = arith.index_cast %arg0 : i32 to index
    %1 = memref.load %arg2[%0] : memref<1xi32, #tpu.memory_space<smem>>
    %2 = arith.index_cast %arg0 : i32 to index
    %3 = memref.load %arg3[%2] : memref<1xi32, #tpu.memory_space<smem>>
    %c1_i32 = arith.constant 1 : i32
    %4 = arith.maxsi %3, %c1_i32 : i32
    %c1_i32_0 = arith.constant 1 : i32
    %5 = arith.subi %4, %c1_i32_0 : i32
    %6 = arith.minsi %arg1, %5 : i32
    %7 = arith.addi %1, %6 : i32
    %c0_i32 = arith.constant 0 : i32
    %c0_i32_1 = arith.constant 0 : i32
    return %7, %c0_i32 : i32, i32
  }
  func.func @transform_4(%arg0: i32, %arg1: i32, %arg2: memref<1xi32, #tpu.memory_space<smem>>, %arg3: memref<1xi32, #tpu.memory_space<smem>>) -> (i32, i32) {
    %c0_i32 = arith.constant 0 : i32
    %c0_i32_0 = arith.constant 0 : i32
    return %arg0, %c0_i32 : i32, i32
  }
  func.func @transform_5(%arg0: i32, %arg1: i32, %arg2: memref<1xi32, #tpu.memory_space<smem>>, %arg3: memref<1xi32, #tpu.memory_space<smem>>) -> (i32, i32) {
    %c0_i32 = arith.constant 0 : i32
    %c0_i32_0 = arith.constant 0 : i32
    %c0_i32_1 = arith.constant 0 : i32
    return %c0_i32, %c0_i32_0 : i32, i32
  }
  func.func @transform_6(%arg0: i32, %arg1: i32, %arg2: memref<1xi32, #tpu.memory_space<smem>>, %arg3: memref<1xi32, #tpu.memory_space<smem>>) -> (i32, i32) {
    %c0_i32 = arith.constant 0 : i32
    %c0_i32_0 = arith.constant 0 : i32
    %c0_i32_1 = arith.constant 0 : i32
    return %c0_i32, %c0_i32_0 : i32, i32
  }
  func.func @transform_7(%arg0: i32, %arg1: i32, %arg2: memref<1xi32, #tpu.memory_space<smem>>, %arg3: memref<1xi32, #tpu.memory_space<smem>>) -> (i32, i32) {
    %c0_i32 = arith.constant 0 : i32
    %c0_i32_0 = arith.constant 0 : i32
    %c0_i32_1 = arith.constant 0 : i32
    return %c0_i32, %c0_i32_0 : i32, i32
  }
  func.func @transform_8(%arg0: i32, %arg1: i32, %arg2: memref<1xi32, #tpu.memory_space<smem>>, %arg3: memref<1xi32, #tpu.memory_space<smem>>) -> (i32, i32) {
    %c0_i32 = arith.constant 0 : i32
    %c0_i32_0 = arith.constant 0 : i32
    %c0_i32_1 = arith.constant 0 : i32
    return %c0_i32, %c0_i32_0 : i32, i32
  }
  func.func @transform_9(%arg0: i32, %arg1: i32, %arg2: memref<1xi32, #tpu.memory_space<smem>>, %arg3: memref<1xi32, #tpu.memory_space<smem>>) -> (i32, i32) {
    %c0_i32 = arith.constant 0 : i32
    %c0_i32_0 = arith.constant 0 : i32
    %c0_i32_1 = arith.constant 0 : i32
    return %c0_i32, %c0_i32_0 : i32, i32
  }
  func.func @transform_10(%arg0: i32, %arg1: i32, %arg2: memref<1xi32, #tpu.memory_space<smem>>, %arg3: memref<1xi32, #tpu.memory_space<smem>>) -> (i32, i32) {
    %c0_i32 = arith.constant 0 : i32
    %c0_i32_0 = arith.constant 0 : i32
    return %arg0, %c0_i32 : i32, i32
  }
}

</mosaic_0001>

<bundles_post_ra>
// kernel: tpu_custom_call.1
= control target key start
LH: loop header
LB: loop body
LE: loop exit
PB: predicated region body
PF: predicated region fallthrough
CT: control target
= control target key end

     0   :  { %19 = vsyncpa [#allocation6], 0  ;;  %s4249_s0 = inlined_call_operand.<no memory space> [shape: s32[1], index: 0, kind: input, shape index: {}]   ;;  %s4250_s1 = inlined_call_operand.<no memory space> [shape: s32[1], index: 1, kind: input, shape index: {}]   ;;  %s4251_s2 = inlined_call_operand.hbm [shape: bf16[128,128], index: 2, kind: input, shape index: {}]   ;;  %s4252_s3 = inlined_call_operand.vmem [shape: f32[128,1], index: 3, kind: input, shape index: {}]   ;;  %s4253_s4 = inlined_call_operand.vmem [shape: s32[1,128], index: 4, kind: input, shape index: {}]   ;;  %s4254_s5 = inlined_call_operand.vmem [shape: s32[128,1], index: 5, kind: input, shape index: {}]   ;;  %s4255_s6 = inlined_call_operand.vmem [shape: bf16[8,128], index: 6, kind: input, shape index: {}]   ;;  %s4256_s7 = inlined_call_operand.hbm [shape: bf16[128,256], index: 7, kind: input, shape index: {}]   ;;  %s4257_s8 = inlined_call_operand.vmem [shape: f32[1,256], index: 8, kind: input, shape index: {}]   ;;  %s4258_s9 = inlined_call_operand.hbm [shape: bf16[128,256], index: 9, kind: input, shape index: {}]   ;;  %s4259_s10 = inlined_call_operand.vmem [shape: bf16[256,256], index: 10, kind: input, shape index: {}]   ;;  %s4260_s11 = inlined_call_operand.vmem [shape: f32[1,256], index: 11, kind: input, shape index: {}]   ;;  %s4261_s12 = inlined_call_operand.hbm [shape: f32[8,128], index: 12, kind: output, shape index: {}]  }
   0x1   :  { %20 = vsyncpa [#allocation9], 0 }
   0x2   :  { %21 = vsyncpa [#allocation7], 0  ;;  %s2768_s21 = smov [#allocation8]   ;;  %p26_p0 = scmp.gt.s32.totalorder %s4250_s1, 1 }
   0x3   :  { %s121_s22 = sshll.u32 %s2768_s21, 4  ;;  %s122_s22 = int_to_ptr.vmem [resolvable:$true] %s121_s22 }
   0x4   :  { %s2688_s25 = scalar_lea.vmem %s122_s22, 2048  ;;  %p2693_p2 = scmp.lt.s32.totalorder %s122_s22, %s122_s22 }
   0x5   :  { %p2689_p1 = scmp.ne.s32.totalorder %s122_s22, %s2688_s25  ;;  %p2694_p3 = scmp.lt.s32.totalorder %s2688_s25, %s2688_s25 }
   0x7   :  { %p2695_p4 = por %p2694_p3, %p2693_p2 }
   0x9   :  { %p2696_p5 = pnand %p2695_p4, %p2689_p1 }
   0xb   :  { %2699 = shalt.err (!%p2696_p5)
}
   0xc   :  { %s2769_s26 = smov 128   ;;  %s2770_s27 = smov 8  }
   0xd   :  { %127 = dma.hbm_to_vmem [thread:$0]  %s4256_s7, 2048, %s122_s22, [#allocation9], %s2769_s26, %s2769_s26, %s2770_s27  }
   0xe   :  { %s27_s14 = scalar_select %p26_p0, %s4250_s1, 1 }
   0xf   :  { %s2771_s16 = smov [#allocation5]   ;;  %s2772_s18 = smov [#allocation10]  }
  0x10   :  { %s2227_s15 = sadd.s32 4294967295, %s27_s14  ;;  %s38_s17 = sshll.u32 %s2771_s16, 4  ;;  %s39_s17 = int_to_ptr.vmem [resolvable:$true] %s38_s17 }
  0x11   :  { %p2228_p6 = scmp.gt.s32.totalorder %s2227_s15, 0  ;;  %s135_s19 = sshll.u32 %s2772_s18, 4  ;;  %s2864_s19 = int_to_ptr.vmem [resolvable:$true] %s135_s19 }
  0x12   :  { %s2702_s13 = scalar_lea.hbm %s4251_s2, 1024 }
  0x13   :  { %s4424_s15 = smov (%p2228_p6, %s2227_s15), 0 }
  0x14   :  { %s2861_s23 = sadd.s32 %s4424_s15, %s4249_s0 }
  0x15   :  { %s2375_s24 = sshll.u32 %s2861_s23, 10 }
  0x16   :  { %s37_s25 = scalar_lea.hbm %s4251_s2, %s2375_s24 }
  0x17   :  { %s2700_s28 = scalar_lea.hbm %s37_s25, 1024  ;;  %p2703_p8 = scmp.lt.s32.totalorder %s37_s25, %s4251_s2 }
  0x18   :  { %p2701_p7 = scmp.ne.s32.totalorder %s37_s25, %s2700_s28  ;;  %p2704_p9 = scmp.lt.s32.totalorder %s2702_s13, %s2700_s28 }
  0x1a   :  { %p2705_p10 = por %p2704_p9, %p2703_p8 }
  0x1c   :  { %p2706_p11 = pnand %p2705_p10, %p2701_p7 }
  0x1e   :  { %2709 = shalt.err (!%p2706_p11)
}
  0x1f   :  { %s2710_s0 = scalar_lea.vmem %s39_s17, 1024  ;;  %p2715_p13 = scmp.lt.s32.totalorder %s39_s17, %s39_s17 }
  0x20   :  { %p2711_p12 = scmp.ne.s32.totalorder %s39_s17, %s2710_s0  ;;  %p2716_p0 = scmp.lt.s32.totalorder %s2710_s0, %s2710_s0 }
  0x22   :  { %p2717_p1 = por %p2716_p0, %p2715_p13 }
  0x24   :  { %p2718_p2 = pnand %p2717_p1, %p2711_p12 }
  0x26   :  { %2721 = shalt.err (!%p2718_p2)
}
  0x27   :  { %s2773_s15 = smov 64   ;;  %s2774_s18 = smov 4  }
  0x28   :  { %44 = dma.hbm_to_vmem [thread:$0]  %s37_s25, 1024, %s39_s17, [#allocation6], %s2773_s15, %s2773_s15, %s2774_s18  }
  0x29   :  { %s2730_s20 = scalar_lea.vmem %s2864_s19, 2048  ;;  %p2735_p4 = scmp.lt.s32.totalorder %s2864_s19, %s2864_s19 }
  0x2a   :  { %p2731_p3 = scmp.ne.s32.totalorder %s2864_s19, %s2730_s20  ;;  %p2736_p5 = scmp.lt.s32.totalorder %s2730_s20, %s2730_s20 }
  0x2c   :  { %p2737_p6 = por %p2736_p5, %p2735_p4 }
  0x2e   :  { %p2738_p7 = pnand %p2737_p6, %p2731_p3 }
  0x30   :  { %2741 = shalt.err (!%p2738_p7)
}
  0x31   :  { %141 = dma.hbm_to_vmem [thread:$0]  %s4258_s9, 2048, %s2864_s19, [#allocation9], %s2769_s26, %s2769_s26, %s2770_s27  }
  0x32   :  { %2762 = dma.done.wait [#allocation6], 1024  }
  0x33   :  { %2763 = vsyncadd [#allocation6], 4294966272 }
  0x34   :  { %2764 = dma.done.wait [#allocation9], 4096  }
  0x35   :  { %2765 = vsyncadd [#allocation9], 4294963200  ;;  %s2233_s17 = sshll.u32 %s2861_s23, 4  ;;  %p231_p8 = scmp.lt.s32.totalorder %s2861_s23, 0  ;;  %v2775_v0 = vmov 0.0  }
  0x36   :  { %p210_p9 = scmp.lt.s32.totalorder %s2233_s17, 15  ;;  %269 = vst [vmem:[#allocation11] sm:$0xff] %v2775_v0  ;;  %p2242_p10 = scmp.le.s32.totalorder %s4250_s1, 0 }
  0x37   :  { %s4426_s23 = smov (!%p231_p8, %s2861_s23), 0 }
  0x38   :  { %s4428_s17 = smov (!%p210_p9, %s2233_s17), 15  ;;  %s233_s9 = scalar_lea.vmem %s4253_s4, %s4426_s23 }
  0x39   :  { %s2234_s26 = sshll.u32 %s4428_s17, 3  ;;  %274 = sbr.rel (%p2242_p10) target bundleno = 1206 (0x4b6), region = 61 }
  0x3a   :  { %s2898_s22 = scalar_lea.vmem %s4252_s3, %s2234_s26  ;;  %s2903_s29 = scalar_lea.vmem %s4254_s5, %s2234_s26 }
  0x3e   :  { %v294_v1 = vld [vmem:[%s2903_s29 + $0x10] sm:$0xff]  ;;  %v292_v2 = vld [vmem:[%s2903_s29] sm:$0xff]  ;;  %v2776_v3 = vmov 0   ;;  %v295_v4 = vld [vmem:[%s2903_s29 + $0x18] sm:$0xff]  ;;  %vm723_vm0 = vcmask 1043456   ;;  %v276_v53 = vlaneseq  ;;  %vm698_vm5 = vcmask 64512  }
  0x3f   :  { %2447 = vset.pattern.permute.xlu1 %v2776_v3  ;;  %2446 = vset.pattern.permute.xlu0 %v2776_v3  ;;  %v293_v5 = vld [vmem:[%s2903_s29 + $0x8] sm:$0xff]  ;;  %v296_v7 = vld [vmem:[%s2903_s29 + $0x20] sm:$0xff]  ;;  %v299_v8 = vld [vmem:[%s2903_s29 + $0x38] sm:$0xff]  ;;  %v4264_v59 = vmov 0.0  }
  0x40   :  { %315 = vperm.xlu1 %2447, %v294_v1   ;;  %309 = vperm.xlu0 %2446, %v292_v2   ;;  %v297_v6 = vld [vmem:[%s2903_s29 + $0x28] sm:$0xff]  ;;  %v298_v9 = vld [vmem:[%s2903_s29 + $0x30] sm:$0xff]  ;;  %v697_v10 = vld [vmem:[%s4255_s6] sm:$0xf]  ;;  %v2947_v54 = vand.u32 127, %v276_v53 }
  0x41   :  { %616 = vmatprep.mubr.bf16.mxu0 %v2776_v3  ;;  %2432 = vmatprep.subr.msk.bf16.mxu1 %vm723_vm0, %v697_v10  ;;  %v725_v11 = vsel %vm723_vm0, %v697_v10, 0  ;;  %v301_v12 = vld [vmem:[%s2903_s29 + $0x48] sm:$0xff]  ;;  %v300_v13 = vld [vmem:[%s2903_s29 + $0x40] sm:$0xff]  ;;  %v303_v14 = vld [vmem:[%s2903_s29 + $0x58] sm:$0xff] }
  0x42   :  { %2395 = vmatpush3.bf16.msra.mxu1 %v725_v11  ;;  %v302_v15 = vld [vmem:[%s2903_s29 + $0x50] sm:$0xff]  ;;  %v305_v16 = vld [vmem:[%s2903_s29 + $0x68] sm:$0xff]  ;;  %v304_v17 = vld [vmem:[%s2903_s29 + $0x60] sm:$0xff] }
  0x43   :  { %v307_v18 = vld [vmem:[%s2903_s29 + $0x78] sm:$0xff]  ;;  %v306_v19 = vld [vmem:[%s2903_s29 + $0x70] sm:$0xff]  ;;  %v2027_v22 = vld [vmem:[%s2898_s22 + $0x68] sm:$0xff] }
  0x44   :  { %318 = vperm.xlu1 %2447, %v295_v4   ;;  %312 = vperm.xlu0 %2446, %v293_v5   ;;  %v2029_v20 = vld [vmem:[%s2898_s22 + $0x78] sm:$0xff]  ;;  %v2028_v21 = vld [vmem:[%s2898_s22 + $0x70] sm:$0xff]  ;;  %v2026_v23 = vld [vmem:[%s2898_s22 + $0x60] sm:$0xff] }
  0x45   :  { %v2025_v24 = vld [vmem:[%s2898_s22 + $0x58] sm:$0xff]  ;;  %v2024_v25 = vld [vmem:[%s2898_s22 + $0x50] sm:$0xff]  ;;  %v2023_v26 = vld [vmem:[%s2898_s22 + $0x48] sm:$0xff] }
  0x46   :  { %v2022_v27 = vld [vmem:[%s2898_s22 + $0x40] sm:$0xff]  ;;  %v2021_v28 = vld [vmem:[%s2898_s22 + $0x38] sm:$0xff]  ;;  %v2020_v29 = vld [vmem:[%s2898_s22 + $0x30] sm:$0xff] }
  0x47   :  { %v2019_v30 = vld [vmem:[%s2898_s22 + $0x28] sm:$0xff]  ;;  %v2018_v31 = vld [vmem:[%s2898_s22 + $0x20] sm:$0xff]  ;;  %v2017_v32 = vld [vmem:[%s2898_s22 + $0x18] sm:$0xff] }
  0x48   :  { %324 = vperm.xlu1 %2447, %v297_v6   ;;  %321 = vperm.xlu0 %2446, %v296_v7   ;;  %v2016_v33 = vld [vmem:[%s2898_s22 + $0x10] sm:$0xff]  ;;  %v2451_v36 = vld [vmem:[#allocation8 + $0x64] ss:$8 sps:$4 sm:$0xff]   ;;  %v2453_v40 = vld [vmem:[#allocation8 + $0x60] ss:$8 sps:$4 sm:$0xff]  }
  0x49   :  { %v2448_v34 = vld [vmem:[#allocation8 + $0x74] ss:$8 sps:$4 sm:$0xff]   ;;  %v2450_v35 = vld [vmem:[#allocation8 + $0x70] ss:$8 sps:$4 sm:$0xff]   ;;  %v2015_v37 = vld [vmem:[%s2898_s22 + $0x8] sm:$0xff] }
  0x4a   :  { %v2014_v38 = vld [vmem:[%s2898_s22] sm:$0xff]  ;;  %584 = vmatprep.subr.bf16.mxu0 %v2448_v34  ;;  %v2458_v39 = vld [vmem:[#allocation10 + $0x74] ss:$8 sps:$4 sm:$0xff]   ;;  %v2459_v42 = vld [vmem:[#allocation8 + $0x50] ss:$8 sps:$4 sm:$0xff]  }
  0x4b   :  { %585 = vmatpush1.bf16.msra.mxu0 %v2450_v35  ;;  %v2454_v41 = vld [vmem:[#allocation8 + $0x54] ss:$8 sps:$4 sm:$0xff]   ;;  %928 = vmatprep.subr.bf16.mxu1 %v2458_v39  ;;  %v2460_v43 = vld [vmem:[#allocation8 + $0x44] ss:$8 sps:$4 sm:$0xff]   ;;  %v2465_v44 = vld [vmem:[#allocation8 + $0x40] ss:$8 sps:$4 sm:$0xff]  }
  0x4c   :  { %330 = vperm.xlu1 %2447, %v299_v8   ;;  %327 = vperm.xlu0 %2446, %v298_v9   ;;  %v2466_v45 = vld [vmem:[#allocation8 + $0x34] ss:$8 sps:$4 sm:$0xff]   ;;  %v2471_v46 = vld [vmem:[#allocation8 + $0x30] ss:$8 sps:$4 sm:$0xff]   ;;  %v2472_v47 = vld [vmem:[#allocation8 + $0x24] ss:$8 sps:$4 sm:$0xff]  }
  0x4d   :  { %586 = vmatprep.subr.bf16.mxu0 %v2451_v36  ;;  %v2477_v48 = vld [vmem:[#allocation8 + $0x20] ss:$8 sps:$4 sm:$0xff]   ;;  %v2478_v49 = vld [vmem:[#allocation8 + $0x14] ss:$8 sps:$4 sm:$0xff]   ;;  %v2483_v50 = vld [vmem:[#allocation8 + $0x10] ss:$8 sps:$4 sm:$0xff]  }
  0x4e   :  { %v2484_v51 = vld [vmem:[#allocation8 + $0x4] ss:$8 sps:$4 sm:$0xff]   ;;  %v2489_v52 = vld [vmem:[#allocation8] ss:$8 sps:$4 sm:$0xff]   ;;  %v2456_v2 = vld [vmem:[#allocation10 + $0x70] ss:$8 sps:$4 sm:$0xff]  }
  0x4f   :  { %587 = vmatpush1.bf16.msra.mxu0 %v2453_v40  ;;  %v2464_v6 = vld [vmem:[#allocation10 + $0x64] ss:$8 sps:$4 sm:$0xff]   ;;  %v2462_v10 = vld [vmem:[#allocation10 + $0x60] ss:$8 sps:$4 sm:$0xff]  }
  0x50   :  { %336 = vperm.xlu1 %2447, %v301_v12   ;;  %333 = vperm.xlu0 %2446, %v300_v13   ;;  %v2470_v13 = vld [vmem:[#allocation10 + $0x54] ss:$8 sps:$4 sm:$0xff]   ;;  %v2488_v34 = vld [vmem:[#allocation10 + $0x24] ss:$8 sps:$4 sm:$0xff]  }
  0x51   :  { %588 = vmatprep.subr.bf16.mxu0 %v2454_v41 }
  0x53   :  { %589 = vmatpush1.bf16.msra.mxu0 %v2459_v42 }
  0x54   :  { %342 = vperm.xlu1 %2447, %v303_v14   ;;  %339 = vperm.xlu0 %2446, %v302_v15  }
  0x55   :  { %590 = vmatprep.subr.bf16.mxu0 %v2460_v43 }
  0x57   :  { %591 = vmatpush1.bf16.msra.mxu0 %v2465_v44  ;;  %v2490_v44 = vld [vmem:[#allocation5] sm:$0xff]  }
  0x58   :  { %348 = vperm.xlu1 %2447, %v305_v16   ;;  %345 = vperm.xlu0 %2446, %v304_v17   ;;  %v2468_v17 = vld [vmem:[#allocation10 + $0x50] ss:$8 sps:$4 sm:$0xff]  }
  0x59   :  { %592 = vmatprep.subr.bf16.mxu0 %v2466_v45  ;;  %v2493_v45 = vld [vmem:[#allocation10 + $0x14] ss:$8 sps:$4 sm:$0xff]  }
  0x5b   :  { %593 = vmatpush1.bf16.msra.mxu0 %v2471_v46  ;;  %v2491_v46 = vld [vmem:[#allocation10 + $0x10] ss:$8 sps:$4 sm:$0xff]  }
  0x5c   :  { %354 = vperm.xlu1 %2447, %v307_v18   ;;  %351 = vperm.xlu0 %2446, %v306_v19  }
  0x5d   :  { %594 = vmatprep.subr.bf16.mxu0 %v2472_v47  ;;  %v2496_v47 = vld [vmem:[#allocation10 + $0x4] ss:$8 sps:$4 sm:$0xff]  }
  0x5f   :  { %595 = vmatpush1.bf16.msra.mxu0 %v2477_v48  ;;  %v2494_v48 = vld [vmem:[#allocation10] ss:$8 sps:$4 sm:$0xff]  }
  0x60   :  { %2107 = vperm.xlu1 %2447, %v2029_v20   ;;  %2102 = vperm.xlu0 %2446, %v2028_v21   ;;  %v2476_v20 = vld [vmem:[#allocation10 + $0x44] ss:$8 sps:$4 sm:$0xff]  }
  0x61   :  { %596 = vmatprep.subr.bf16.mxu0 %v2478_v49  ;;  %v2497_v49 = vld [vmem:[#allocation5 + $0x8] sm:$0xff]  }
  0x63   :  { %597 = vmatpush1.bf16.msra.mxu0 %v2483_v50  ;;  %v2498_v50 = vld [vmem:[#allocation5 + $0x10] sm:$0xff]  }
  0x64   :  { %2097 = vperm.xlu1 %2447, %v2027_v22   ;;  %2092 = vperm.xlu0 %2446, %v2026_v23  }
  0x65   :  { %598 = vmatprep.subr.bf16.mxu0 %v2484_v51  ;;  %v2499_v51 = vld [vmem:[#allocation5 + $0x18] sm:$0xff]  }
  0x67   :  { %599 = vmatpush1.bf16.msra.mxu0 %v2489_v52  ;;  %v2500_v52 = vld [vmem:[#allocation5 + $0x20] sm:$0xff]  }
  0x68   :  { %2087 = vperm.xlu1 %2447, %v2025_v24   ;;  %2082 = vperm.xlu0 %2446, %v2024_v25   ;;  %v2474_v24 = vld [vmem:[#allocation10 + $0x40] ss:$8 sps:$4 sm:$0xff]  }
  0x6a   :  { %617 = vmatmul.mubr.bf16.vlgmr.msra.gmra.mxu0 %v2490_v44 }
  0x6b   :  { %626 = vmatprep.mubr.bf16.mxu0 %v2776_v3 }
  0x6c   :  { %2077 = vperm.xlu1 %2447, %v2023_v26   ;;  %2072 = vperm.xlu0 %2446, %v2022_v27   ;;  %v2482_v27 = vld [vmem:[#allocation10 + $0x34] ss:$8 sps:$4 sm:$0xff]  }
  0x70   :  { %2067 = vperm.xlu1 %2447, %v2021_v28   ;;  %2062 = vperm.xlu0 %2446, %v2020_v29  }
  0x72   :  { %627 = vmatmul.mubr.bf16.gmra.mxu0 %v2497_v49 }
  0x73   :  { %636 = vmatprep.mubr.bf16.mxu0 %v2776_v3 }
  0x74   :  { %2057 = vperm.xlu1 %2447, %v2019_v30   ;;  %2052 = vperm.xlu0 %2446, %v2018_v31   ;;  %v2480_v31 = vld [vmem:[#allocation10 + $0x30] ss:$8 sps:$4 sm:$0xff]  }
  0x78   :  { %2047 = vperm.xlu1 %2447, %v2017_v32   ;;  %2042 = vperm.xlu0 %2446, %v2016_v33  }
  0x7a   :  { %637 = vmatmul.mubr.bf16.gmra.mxu0 %v2498_v50  ;;  %v2542_v50 = vld [vmem:[%s4259_s10 + $0xb4] ss:$8 sps:$4 sm:$0xff]  }
  0x7b   :  { %646 = vmatprep.mubr.bf16.mxu0 %v2776_v3 }
  0x7c   :  { %2037 = vperm.xlu1 %2447, %v2015_v37   ;;  %2032 = vperm.xlu0 %2446, %v2014_v38   ;;  %v2486_v38 = vld [vmem:[#allocation10 + $0x20] ss:$8 sps:$4 sm:$0xff]  }
  0x82   :  { %647 = vmatmul.mubr.bf16.gmra.mxu0 %v2499_v51  ;;  %v2540_v51 = vld [vmem:[%s4259_s10 + $0xb0] ss:$8 sps:$4 sm:$0xff]  }
  0x83   :  { %656 = vmatprep.mubr.bf16.mxu0 %v2776_v3 }
  0x8a   :  { %657 = vmatmul.mubr.bf16.gmra.mxu0 %v2500_v52 }
  0x8b   :  { %666 = vmatprep.mubr.bf16.mxu0 %v2776_v3 }
  0xbb   :  { %v316_v55 = vpop.permute.xlu1 %315  ;;  %v310_v56 = vpop.permute.xlu0 %309 }
  0xbc   :  { %vm358_vm1 = vcmp.eq.s32.totalorder %v2947_v54, %v316_v55  ;;  %vm356_vm2 = vcmp.eq.s32.totalorder %v2947_v54, %v310_v56  ;;  %v2502_v55 = vld [vmem:[#allocation5 + $0x30] sm:$0xff]   ;;  %v2503_v56 = vld [vmem:[#allocation5 + $0x38] sm:$0xff]  }
  0xbd   :  { %v2247_v60 = vsel %vm358_vm1, 1.0, %v4264_v59  ;;  %v2245_v61 = vsel %vm356_vm2, 1.0, %v4264_v59 }
  0xbf   :  { %v319_v57 = vpop.permute.xlu1 %318  ;;  %v313_v58 = vpop.permute.xlu0 %312 }
  0xc0   :  { %vm359_vm3 = vcmp.eq.s32.totalorder %v2947_v54, %v319_v57  ;;  %vm357_vm4 = vcmp.eq.s32.totalorder %v2947_v54, %v313_v58  ;;  %v2504_v57 = vld [vmem:[%s4259_s10 + $0x70] ss:$8 sps:$4 sm:$0xff]   ;;  %v2506_v58 = vld [vmem:[%s4259_s10 + $0x74] ss:$8 sps:$4 sm:$0xff]  }
  0xc1   :  { %v2248_v62 = vsel %vm359_vm3, 1.0, %v4264_v59  ;;  %v2246_v63 = vsel %vm357_vm4, 1.0, %v4264_v59  ;;  %1901 = vmatprep.subr.bf16.mxu0 %v2506_v58 }
  0xc2   :  { %v405_v0 = vpack.c.bf16 %v2248_v62, %v2247_v60  ;;  %v404_v1 = vpack.c.bf16 %v2246_v63, %v2245_v61  ;;  %1902 = vmatpush1.bf16.msra.mxu0 %v2504_v57  ;;  %v2507_v60 = vld [vmem:[%s4259_s10 + $0x60] ss:$8 sps:$4 sm:$0xff]   ;;  %v2509_v61 = vld [vmem:[%s4259_s10 + $0x64] ss:$8 sps:$4 sm:$0xff]  }
  0xc3   :  { %v325_v4 = vpop.permute.xlu1 %324  ;;  %v322_v5 = vpop.permute.xlu0 %321  ;;  %1903 = vmatprep.subr.bf16.mxu0 %v2509_v61  ;;  %v2543_v57 = vld [vmem:[%s4259_s10 + $0xa0] ss:$8 sps:$4 sm:$0xff]  }
  0xc4   :  { %vm361_vm6 = vcmp.eq.s32.totalorder %v2947_v54, %v325_v4  ;;  %vm360_vm7 = vcmp.eq.s32.totalorder %v2947_v54, %v322_v5  ;;  %2396 = vmatprep.mubr.msk.bf16.mxu1 %vm698_vm5, %v404_v1 }
  0xc5   :  { %v2250_v7 = vsel %vm361_vm6, 1.0, %v4264_v59  ;;  %v2249_v8 = vsel %vm360_vm7, 1.0, %v4264_v59  ;;  %2397 = vmatmul.mubr.msk.bf16.vlgmr.msra.gmra.mxu1 %vm698_vm5, %v405_v0 }
  0xc6   :  { %v406_v9 = vpack.c.bf16 %v2250_v7, %v2249_v8  ;;  %929 = vmatpush1.bf16.msra.mxu1 %v2456_v2  ;;  %1904 = vmatpush1.bf16.msra.mxu0 %v2507_v60 }
  0xc7   :  { %v331_v11 = vpop.permute.xlu1 %330  ;;  %v328_v12 = vpop.permute.xlu0 %327  ;;  %930 = vmatprep.subr.bf16.mxu1 %v2464_v6 }
  0xc8   :  { %vm363_vm8 = vcmp.eq.s32.totalorder %v2947_v54, %v331_v11  ;;  %vm362_vm9 = vcmp.eq.s32.totalorder %v2947_v54, %v328_v12  ;;  %2400 = vmatprep.mubr.msk.bf16.mxu1 %vm698_vm5, %v406_v9 }
  0xc9   :  { %v2252_v14 = vsel %vm363_vm8, 1.0, %v4264_v59  ;;  %v2251_v15 = vsel %vm362_vm9, 1.0, %v4264_v59 }
  0xca   :  { %v407_v16 = vpack.c.bf16 %v2252_v14, %v2251_v15  ;;  %931 = vmatpush1.bf16.msra.mxu1 %v2462_v10 }
  0xcb   :  { %v337_v18 = vpop.permute.xlu1 %336  ;;  %v334_v19 = vpop.permute.xlu0 %333  ;;  %932 = vmatprep.subr.bf16.mxu1 %v2470_v13 }
  0xcc   :  { %vm365_vm10 = vcmp.eq.s32.totalorder %v2947_v54, %v337_v18  ;;  %vm364_vm11 = vcmp.eq.s32.totalorder %v2947_v54, %v334_v19 }
  0xcd   :  { %v2254_v21 = vsel %vm365_vm10, 1.0, %v4264_v59  ;;  %v2253_v22 = vsel %vm364_vm11, 1.0, %v4264_v59  ;;  %2401 = vmatmul.mubr.msk.bf16.gmra.mxu1 %vm698_vm5, %v407_v16 }
  0xce   :  { %v408_v23 = vpack.c.bf16 %v2254_v21, %v2253_v22  ;;  %933 = vmatpush1.bf16.msra.mxu1 %v2468_v17 }
  0xcf   :  { %v343_v25 = vpop.permute.xlu1 %342  ;;  %v340_v26 = vpop.permute.xlu0 %339  ;;  %934 = vmatprep.subr.bf16.mxu1 %v2476_v20 }
  0xd0   :  { %vm367_vm12 = vcmp.eq.s32.totalorder %v2947_v54, %v343_v25  ;;  %vm366_vm13 = vcmp.eq.s32.totalorder %v2947_v54, %v340_v26  ;;  %2404 = vmatprep.mubr.msk.bf16.mxu1 %vm698_vm5, %v408_v23  ;;  %v2512_v23 = vld [vmem:[%s4259_s10 + $0x54] ss:$8 sps:$4 sm:$0xff]   ;;  %v2515_v25 = vld [vmem:[%s4259_s10 + $0x44] ss:$8 sps:$4 sm:$0xff]  }
  0xd1   :  { %v2256_v28 = vsel %vm367_vm12, 1.0, %v4264_v59  ;;  %v2255_v29 = vsel %vm366_vm13, 1.0, %v4264_v59  ;;  %1905 = vmatprep.subr.bf16.mxu0 %v2512_v23  ;;  %v2518_v26 = vld [vmem:[%s4259_s10 + $0x34] ss:$8 sps:$4 sm:$0xff]  }
  0xd2   :  { %v409_v30 = vpack.c.bf16 %v2256_v28, %v2255_v29  ;;  %935 = vmatpush1.bf16.msra.mxu1 %v2474_v24  ;;  %v2510_v24 = vld [vmem:[%s4259_s10 + $0x50] ss:$8 sps:$4 sm:$0xff]   ;;  %v2521_v28 = vld [vmem:[%s4259_s10 + $0x24] ss:$8 sps:$4 sm:$0xff]   ;;  %v2519_v29 = vld [vmem:[%s4259_s10 + $0x20] ss:$8 sps:$4 sm:$0xff]  }
  0xd3   :  { %v349_v32 = vpop.permute.xlu1 %348  ;;  %v346_v33 = vpop.permute.xlu0 %345  ;;  %936 = vmatprep.subr.bf16.mxu1 %v2482_v27  ;;  %1906 = vmatpush1.bf16.msra.mxu0 %v2510_v24  ;;  %v2516_v27 = vld [vmem:[%s4259_s10 + $0x30] ss:$8 sps:$4 sm:$0xff]  }
  0xd4   :  { %vm369_vm14 = vcmp.eq.s32.totalorder %v2947_v54, %v349_v32  ;;  %vm368_vm15 = vcmp.eq.s32.totalorder %v2947_v54, %v346_v33  ;;  %1907 = vmatprep.subr.bf16.mxu0 %v2515_v25  ;;  %v2527_v32 = vld [vmem:[%s4259_s10 + $0x4] ss:$8 sps:$4 sm:$0xff]   ;;  %v2525_v33 = vld [vmem:[%s4259_s10] ss:$8 sps:$4 sm:$0xff]  }
  0xd5   :  { %v2258_v35 = vsel %vm369_vm14, 1.0, %v4264_v59  ;;  %v2257_v36 = vsel %vm368_vm15, 1.0, %v4264_v59  ;;  %2405 = vmatmul.mubr.msk.bf16.gmra.mxu1 %vm698_vm5, %v409_v30  ;;  %v2524_v30 = vld [vmem:[%s4259_s10 + $0x14] ss:$8 sps:$4 sm:$0xff]  }
  0xd6   :  { %v410_v37 = vpack.c.bf16 %v2258_v35, %v2257_v36  ;;  %937 = vmatpush1.bf16.msra.mxu1 %v2480_v31  ;;  %v2522_v31 = vld [vmem:[%s4259_s10 + $0x10] ss:$8 sps:$4 sm:$0xff]   ;;  %v2530_v36 = vld [vmem:[%s4259_s10 + $0xf4] ss:$8 sps:$4 sm:$0xff]  }
  0xd7   :  { %v355_v39 = vpop.permute.xlu1 %354  ;;  %v352_v40 = vpop.permute.xlu0 %351  ;;  %938 = vmatprep.subr.bf16.mxu1 %v2488_v34 }
  0xd8   :  { %vm371_vm0 = vcmp.eq.s32.totalorder %v2947_v54, %v355_v39  ;;  %vm370_vm1 = vcmp.eq.s32.totalorder %v2947_v54, %v352_v40  ;;  %2408 = vmatprep.mubr.msk.bf16.mxu1 %vm698_vm5, %v410_v37  ;;  %v2501_v54 = vld [vmem:[#allocation5 + $0x28] sm:$0xff]   ;;  %v2528_v37 = vld [vmem:[%s4259_s10 + $0xf0] ss:$8 sps:$4 sm:$0xff]  }
  0xd9   :  { %v2260_v41 = vsel %vm371_vm0, 1.0, %v4264_v59  ;;  %v2259_v42 = vsel %vm370_vm1, 1.0, %v4264_v59  ;;  %667 = vmatmul.mubr.bf16.gmra.mxu0 %v2501_v54  ;;  %v2533_v40 = vld [vmem:[%s4259_s10 + $0xe4] ss:$8 sps:$4 sm:$0xff]  }
  0xda   :  { %v411_v43 = vpack.c.bf16 %v2260_v41, %v2259_v42  ;;  %939 = vmatpush1.bf16.msra.mxu1 %v2486_v38  ;;  %676 = vmatprep.mubr.bf16.mxu0 %v2776_v3  ;;  %v2531_v41 = vld [vmem:[%s4259_s10 + $0xe0] ss:$8 sps:$4 sm:$0xff]  }
  0xdb   :  { %940 = vmatprep.subr.bf16.mxu1 %v2493_v45  ;;  %v2534_v45 = vld [vmem:[%s4259_s10 + $0xd0] ss:$8 sps:$4 sm:$0xff]  }
  0xdd   :  { %2409 = vmatmul.mubr.msk.bf16.gmra.mxu1 %vm698_vm5, %v411_v43  ;;  %v2536_v43 = vld [vmem:[%s4259_s10 + $0xd4] ss:$8 sps:$4 sm:$0xff]  }
  0xde   :  { %960 = vmatprep.mubr.bf16.mxu1 %v2776_v3  ;;  %941 = vmatpush1.bf16.msra.mxu1 %v2491_v46 }
  0xdf   :  { %942 = vmatprep.subr.bf16.mxu1 %v2496_v47  ;;  %v2539_v47 = vld [vmem:[%s4259_s10 + $0xc4] ss:$8 sps:$4 sm:$0xff]  }
  0xe1   :  { %677 = vmatmul.mubr.bf16.gmra.mxu0 %v2502_v55 }
  0xe2   :  { %943 = vmatpush1.bf16.msra.mxu1 %v2494_v48  ;;  %686 = vmatprep.mubr.bf16.mxu0 %v2776_v3  ;;  %v2537_v48 = vld [vmem:[%s4259_s10 + $0xc0] ss:$8 sps:$4 sm:$0xff]  }
  0xe3   :  { %2412 = vmatprep.subr.bf16.mxu1 %v4264_v59 }
  0xe9   :  { %687 = vmatmul.mubr.bf16.gmra.mxu0 %v2503_v56  ;;  %v2545_v56 = vld [vmem:[%s4259_s10 + $0xa4] ss:$8 sps:$4 sm:$0xff]  }
 0x12a   :  { %v618_v34 = vpop.f32.mrf.mxu0 }
 0x12c   :  { %v620_v35 = vpop.f32.mrf.mxu0 }
 0x12e   :  { %v622_v38 = vpop.f32.mrf.mxu0 }
 0x130   :  { %v3059_v39 = vpop.f32.mrf.mxu0 }
 0x132   :  { %v628_v42 = vpop.f32.mrf.mxu0 }
 0x134   :  { %v3070_v44 = vpop.f32.mrf.mxu0 }
 0x136   :  { %v3075_v46 = vpop.f32.mrf.mxu0 }
 0x138   :  { %v3083_v49 = vpop.f32.mrf.mxu0 }
 0x13a   :  { %v3091_v52 = vpop.f32.mrf.mxu0 }
 0x13c   :  { %v3093_v54 = vpop.f32.mrf.mxu0 }
 0x13e   :  { %v3095_v55 = vpop.f32.mrf.mxu0 }
 0x140   :  { %v3103_v58 = vpop.f32.mrf.mxu0 }
 0x142   :  { %v3105_v60 = vpop.f32.mrf.mxu0 }
 0x144   :  { %v3107_v61 = vpop.f32.mrf.mxu0 }
 0x185   :  { %v2398_v62 = vpop.f32.mrf.mxu1 }
 0x187   :  { %v761_v63 = vpop.f32.mrf.mxu1 }
 0x189   :  { %v2399_v0 = vpop.f32.mrf.mxu1 }
 0x18a   :  { %v825_v6 = vpack.c.bf16 %v2399_v0, %v2398_v62  ;;  %v2548_v62 = vld [vmem:[%s4259_s10 + $0x94] ss:$8 sps:$4 sm:$0xff]   ;;  %v3115_v0 = vpop.f32.mrf.mxu0 }
 0x18b   :  { %v764_v1 = vpop.f32.mrf.mxu1 }
 0x18c   :  { %v824_v2 = vpack.c.bf16 %v764_v1, %v761_v63  ;;  %v2546_v63 = vld [vmem:[%s4259_s10 + $0x90] ss:$8 sps:$4 sm:$0xff]   ;;  %v2551_v1 = vld [vmem:[%s4259_s10 + $0x84] ss:$8 sps:$4 sm:$0xff]  }
 0x18d   :  { %v2402_v4 = vpop.f32.mrf.mxu1 }
 0x18e   :  { %961 = vmatmul.mubr.bf16.vlgmr.msra.gmra.mxu1 %v824_v2  ;;  %v3120_v2 = vpop.f32.mrf.mxu0 }
 0x18f   :  { %970 = vmatprep.mubr.bf16.mxu1 %v2776_v3  ;;  %v777_v5 = vpop.f32.mrf.mxu1 }
 0x191   :  { %v2403_v7 = vpop.f32.mrf.mxu1 }
 0x192   :  { %v827_v12 = vpack.c.bf16 %v2403_v7, %v2402_v4  ;;  %v2549_v4 = vld [vmem:[%s4259_s10 + $0x80] ss:$8 sps:$4 sm:$0xff]  }
 0x193   :  { %v780_v8 = vpop.f32.mrf.mxu1 }
 0x194   :  { %v826_v9 = vpack.c.bf16 %v780_v8, %v777_v5  ;;  %v3125_v5 = vpop.f32.mrf.mxu0  ;;  %v3132_v8 = vshrl.u32 %v276_v53, 7 }
 0x195   :  { %v2406_v10 = vpop.f32.mrf.mxu1 }
 0x196   :  { %971 = vmatmul.mubr.bf16.gmra.mxu1 %v825_v6  ;;  %v3127_v6 = vpop.f32.mrf.mxu0  ;;  %4286 = vst [vmem:[#allocation15_spill] sm:$0xff] %v3132_v8 }
 0x197   :  { %980 = vmatprep.mubr.bf16.mxu1 %v2776_v3  ;;  %v793_v11 = vpop.f32.mrf.mxu1 }
 0x198   :  { %v3129_v7 = vpop.f32.mrf.mxu0 }
 0x199   :  { %v2407_v13 = vpop.f32.mrf.mxu1 }
 0x19a   :  { %v829_v18 = vpack.c.bf16 %v2407_v13, %v2406_v10  ;;  %v4262_v10 = vsub.s32 0, %v3132_v8 }
 0x19b   :  { %v796_v14 = vpop.f32.mrf.mxu1 }
 0x19c   :  { %v828_v15 = vpack.c.bf16 %v796_v14, %v793_v11  ;;  %v444_v11 = vld [vmem:[%s4257_s8] sm:$0x3]  ;;  %v4263_v14 = vsub.s32 1, %v3132_v8 }
 0x19d   :  { %v2410_v16 = vpop.f32.mrf.mxu1  ;;  %v3144_v13 = vrot.slane %v444_v11, %v4262_v10 }
 0x19e   :  { %981 = vmatmul.mubr.bf16.gmra.mxu1 %v826_v9  ;;  %v3134_v9 = vpop.f32.mrf.mxu0 }
 0x19f   :  { %990 = vmatprep.mubr.bf16.mxu1 %v2776_v3  ;;  %v809_v17 = vpop.f32.mrf.mxu1  ;;  %v619_v53 = vadd.f32 %v618_v34, %v3144_v13  ;;  %v623_v23 = vadd.f32 %v622_v38, %v3144_v13 }
 0x1a1   :  { %v2411_v19 = vpop.f32.mrf.mxu1 }
 0x1a2   :  { %v831_v22 = vpack.c.bf16 %v2411_v19, %v2410_v16  ;;  %v3152_v16 = vrot.slane %v444_v11, %v4263_v14 }
 0x1a3   :  { %v812_v20 = vpop.f32.mrf.mxu1 }
 0x1a4   :  { %v830_v21 = vpack.c.bf16 %v812_v20, %v809_v17  ;;  %v621_v19 = vadd.f32 %v620_v35, %v3152_v16 }
 0x1a6   :  { %991 = vmatmul.mubr.bf16.gmra.mxu1 %v827_v12  ;;  %v3140_v12 = vpop.f32.mrf.mxu0 }
 0x1a7   :  { %1000 = vmatprep.mubr.bf16.mxu1 %v2776_v3 }
 0x1ae   :  { %1001 = vmatmul.mubr.bf16.gmra.mxu1 %v828_v15  ;;  %v3147_v15 = vpop.f32.mrf.mxu0 }
 0x1af   :  { %1010 = vmatprep.mubr.bf16.mxu1 %v2776_v3 }
 0x1b0   :  { %v3154_v17 = vpop.f32.mrf.mxu0 }
 0x1b6   :  { %1011 = vmatmul.mubr.bf16.gmra.mxu1 %v829_v18 }
 0x1b7   :  { %1020 = vmatprep.mubr.bf16.mxu1 %v2776_v3 }
 0x1be   :  { %1021 = vmatmul.mubr.bf16.gmra.mxu1 %v830_v21 }
 0x1bf   :  { %1030 = vmatprep.mubr.bf16.mxu1 %v2776_v3  ;;  %v2513_v3 = vld [vmem:[%s4259_s10 + $0x40] ss:$8 sps:$4 sm:$0xff]  }
 0x1c0   :  { %1908 = vmatpush1.bf16.msra.mxu0 %v2513_v3 }
 0x1c1   :  { %1909 = vmatprep.subr.bf16.mxu0 %v2518_v26  ;;  %v629_v26 = vadd.f32 %v628_v42, %v3144_v13 }
 0x1c4   :  { %1910 = vmatpush1.bf16.msra.mxu0 %v2516_v27 }
 0x1c5   :  { %1911 = vmatprep.subr.bf16.mxu0 %v2521_v28 }
 0x1c6   :  { %1031 = vmatmul.mubr.bf16.gmra.mxu1 %v831_v22  ;;  %v3159_v22 = vpop.f32.mrf.mxu0 }
 0x1c8   :  { %1912 = vmatpush1.bf16.msra.mxu0 %v2519_v29  ;;  %v625_v29 = vadd.f32 %v3059_v39, %v3152_v16  ;;  %v631_v39 = vadd.f32 %v3070_v44, %v3152_v16  ;;  %v639_v44 = vadd.f32 %v3091_v52, %v3144_v13 }
 0x1c9   :  { %1913 = vmatprep.subr.bf16.mxu0 %v2524_v30 }
 0x1cc   :  { %1914 = vmatpush1.bf16.msra.mxu0 %v2522_v31 }
 0x1cd   :  { %1915 = vmatprep.subr.bf16.mxu0 %v2527_v32  ;;  %v3171_v32 = vpop.f32.mrf.mxu0 }
 0x1cf   :  { %v3178_v42 = vpop.f32.mrf.mxu0 }
 0x1d0   :  { %1916 = vmatpush1.bf16.msra.mxu0 %v2525_v33 }
 0x1d1   :  { %1917 = vmatprep.subr.bf16.mxu0 %v2530_v36 }
 0x1d4   :  { %1918 = vmatpush2.bf16.msra.mxu0 %v2528_v37 }
 0x1d5   :  { %1919 = vmatprep.subr.bf16.mxu0 %v2533_v40 }
 0x1d8   :  { %1920 = vmatpush2.bf16.msra.mxu0 %v2531_v41 }
 0x1d9   :  { %1921 = vmatprep.subr.bf16.mxu0 %v2536_v43 }
 0x1dc   :  { %1922 = vmatpush2.bf16.msra.mxu0 %v2534_v45 }
 0x1dd   :  { %1923 = vmatprep.subr.bf16.mxu0 %v2539_v47 }
 0x1e0   :  { %1924 = vmatpush2.bf16.msra.mxu0 %v2537_v48  ;;  %v633_v48 = vadd.f32 %v3075_v46, %v3144_v13 }
 0x1e1   :  { %1925 = vmatprep.subr.bf16.mxu0 %v2542_v50 }
 0x1e4   :  { %1926 = vmatpush2.bf16.msra.mxu0 %v2540_v51 }
 0x1e5   :  { %1927 = vmatprep.subr.bf16.mxu0 %v2545_v56  ;;  %v635_v56 = vadd.f32 %v3083_v49, %v3152_v16 }
 0x1e8   :  { %1928 = vmatpush2.bf16.msra.mxu0 %v2543_v57 }
 0x1e9   :  { %1929 = vmatprep.subr.bf16.mxu0 %v2548_v62 }
 0x1ec   :  { %1930 = vmatpush2.bf16.msra.mxu0 %v2546_v63  ;;  %v3190_v63 = vpop.f32.mrf.mxu0 }
 0x1ed   :  { %1931 = vmatprep.subr.bf16.mxu0 %v2551_v1 }
 0x1f0   :  { %1932 = vmatpush2.bf16.msra.mxu0 %v2549_v4 }
 0x24e   :  { %v962_v18 = vpop.f32.mrf.mxu1 }
 0x24f   :  { %v3157_v20 = vadd.f32 %v962_v18, %v619_v53 }
 0x250   :  { %v964_v21 = vpop.f32.mrf.mxu1 }
 0x251   :  { %v1169_v24 = vand.u32 2147483647, %v3157_v20  ;;  %v3163_v25 = vadd.f32 %v964_v21, %v621_v19  ;;  %v684_v19 = vpop.f32.mrf.mxu0  ;;  %vm1105_vm5 = vcmp.ne.f32.partialorder %v3157_v20, %v3157_v20 }
 0x252   :  { %v966_v3 = vpop.f32.mrf.mxu1 }
 0x253   :  { %v1170_v27 = vand.u32 2147483647, %v3163_v25  ;;  %v3167_v28 = vadd.f32 %v966_v3, %v623_v23  ;;  %v1201_v30 = vsub.f32 0.0, %v1169_v24 }
 0x254   :  { %v968_v31 = vpop.f32.mrf.mxu1 }
 0x255   :  { %v1171_v33 = vand.u32 2147483647, %v3167_v28  ;;  %v3174_v34 = vadd.f32 %v968_v31, %v625_v29  ;;  %v1202_v36 = vsub.f32 0.0, %v1170_v27  ;;  %v1233_v38 = vmul.f32 1.442695, %v1201_v30  ;;  %v688_v30 = vpop.f32.mrf.mxu0 }
 0x256   :  { %v972_v35 = vpop.f32.mrf.mxu1  ;;  %vm1107_vm7 = vcmp.ne.f32.partialorder %v3167_v28, %v3167_v28 }
 0x257   :  { %v3176_v37 = vadd.f32 %v972_v35, %v629_v26  ;;  %v1203_v40 = vsub.f32 0.0, %v1171_v33  ;;  %v1172_v43 = vand.u32 2147483647, %v3174_v34  ;;  %v1235_v47 = vmul.f32 1.442695, %v1202_v36 }
 0x258   :  { %v974_v41 = vpop.f32.mrf.mxu1  ;;  %2552 = vpow2.f32 %v1233_v38  ;;  %v641_v26 = vadd.f32 %v3093_v54, %v3152_v16 }
 0x259   :  { %v1173_v50 = vand.u32 2147483647, %v3176_v37  ;;  %v1237_v51 = vmul.f32 1.442695, %v1203_v40  ;;  %v3188_v57 = vadd.f32 %v974_v41, %v631_v39  ;;  %v1204_v4 = vsub.f32 0.0, %v1172_v43  ;;  %v690_v41 = vpop.f32.mrf.mxu0 }
 0x25a   :  { %v976_v45 = vpop.f32.mrf.mxu1  ;;  %2554 = vpow2.f32 %v1235_v47  ;;  %v643_v47 = vadd.f32 %v3095_v55, %v3144_v13  ;;  %v3233_v55 = vadd.f32 %v3125_v5, %v3144_v13 }
 0x25b   :  { %v3194_v1 = vadd.f32 %v976_v45, %v633_v48  ;;  %v1205_v53 = vsub.f32 0.0, %v1173_v50  ;;  %2556 = vpow2.f32 %v1237_v51  ;;  %v1174_v18 = vand.u32 2147483647, %v3188_v57 }
 0x25c   :  { %v978_v62 = vpop.f32.mrf.mxu1  ;;  %v1239_v24 = vmul.f32 1.442695, %v1204_v4  ;;  %v645_v48 = vadd.f32 %v3103_v58, %v3152_v16  ;;  %v3217_v51 = vadd.f32 %v3105_v60, %v3144_v13 }
 0x25d   :  { %v3196_v11 = vadd.f32 %v978_v62, %v635_v56  ;;  %v1175_v21 = vand.u32 2147483647, %v3194_v1  ;;  %v1241_v3 = vmul.f32 1.442695, %v1205_v53  ;;  %v1206_v27 = vsub.f32 0.0, %v1174_v18 }
 0x25e   :  { %v982_v46 = vpop.f32.mrf.mxu1  ;;  %2558 = vpow2.f32 %v1239_v24  ;;  %v3221_v56 = vadd.f32 %v3107_v61, %v3152_v16  ;;  %v3225_v62 = vadd.f32 %v3115_v0, %v3144_v13  ;;  %v3244_v0 = vadd.f32 %v3127_v6, %v3152_v16 }
 0x25f   :  { %v3200_v23 = vadd.f32 %v982_v46, %v639_v44  ;;  %v1176_v52 = vand.u32 2147483647, %v3196_v11  ;;  %v1207_v31 = vsub.f32 0.0, %v1175_v21  ;;  %2560 = vpow2.f32 %v1241_v3  ;;  %v692_v46 = vpop.f32.mrf.mxu0 }
 0x260   :  { %v984_v49 = vpop.f32.mrf.mxu1  ;;  %v1243_v38 = vmul.f32 1.442695, %v1206_v27  ;;  %v3229_v44 = vadd.f32 %v3120_v2, %v3152_v16  ;;  %v3250_v18 = vadd.f32 %v3129_v7, %v3144_v13  ;;  %v3258_v21 = vadd.f32 %v3140_v12, %v3144_v13 }
 0x261   :  { %v1177_v33 = vand.u32 2147483647, %v3200_v23  ;;  %v3206_v35 = vadd.f32 %v984_v49, %v641_v26  ;;  %v1208_v36 = vsub.f32 0.0, %v1176_v52  ;;  %v1245_v43 = vmul.f32 1.442695, %v1207_v31 }
 0x262   :  { %v986_v29 = vpop.f32.mrf.mxu1  ;;  %2562 = vpow2.f32 %v1243_v38  ;;  %v3254_v49 = vadd.f32 %v3134_v9, %v3152_v16  ;;  %v3262_v6 = vadd.f32 %v3147_v15, %v3152_v16  ;;  %v3267_v52 = vadd.f32 %v3154_v17, %v3144_v13  ;;  %v694_v17 = vpop.f32.mrf.mxu0 }
 0x263   :  { %v1209_v45 = vsub.f32 0.0, %v1177_v33  ;;  %v1178_v54 = vand.u32 2147483647, %v3206_v35  ;;  %v1247_v50 = vmul.f32 1.442695, %v1208_v36  ;;  %v3238_v4 = vadd.f32 %v986_v29, %v643_v47 }
 0x264   :  { %v988_v40 = vpop.f32.mrf.mxu1  ;;  %2564 = vpow2.f32 %v1245_v43  ;;  %v3271_v7 = vadd.f32 %v3159_v22, %v3152_v16  ;;  %v3275_v9 = vadd.f32 %v3171_v32, %v3144_v13  ;;  %v3283_v26 = vadd.f32 %v3178_v42, %v3152_v16 }
 0x265   :  { %v3208_v39 = vpop.eup %2552  ;;  %4287 = vst [vmem:[#allocation16_spill] sm:$0xff] %v3238_v4  ;;  %v1249_v53 = vmul.f32 1.442695, %v1209_v45  ;;  %v1210_v5 = vsub.f32 0.0, %v1178_v54  ;;  %2566 = vpow2.f32 %v1247_v50  ;;  %v1179_v15 = vand.u32 2147483647, %v3238_v4 }
 0x266   :  { %v1297_v60 = vadd.f32 1.0, %v3208_v39  ;;  %v3240_v61 = vpop.f32.mrf.mxu1  ;;  %4288 = vst [vmem:[#allocation17_spill] sm:$0xff] %v3283_v26  ;;  %v3287_v22 = vadd.f32 %v3190_v63, %v3144_v13  ;;  %v3290_v32 = vadd.f32 %v684_v19, %v3152_v16  ;;  %v1300_v29 = vmul.f32 -0.5, %v3208_v39 }
 0x267   :  { %v3235_v58 = vpop.eup %2554  ;;  %v1251_v27 = vmul.f32 1.442695, %v1210_v5  ;;  %v3294_v31 = vadd.f32 %v688_v30, %v3144_v13  ;;  %v3297_v33 = vadd.f32 %v690_v41, %v3152_v16  ;;  %v3300_v42 = vadd.f32 %v692_v46, %v3144_v13 }
 0x268   :  { %v3246_v2 = vpop.eup %2556  ;;  %v1306_v24 = vadd.f32 1.0, %v3235_v58  ;;  %2568 = vlog2.f32 %v1297_v60  ;;  %v3279_v3 = vpop.f32.mrf.mxu1  ;;  %4289 = vst [vmem:[#allocation18_spill] sm:$0xff] %v3287_v22  ;;  %4290 = vst [vmem:[#allocation19_spill] sm:$0xff] %v3290_v32  ;;  %v3307_v19 = vadd.f32 %v694_v17, %v3152_v16  ;;  %v1309_v30 = vmul.f32 -0.5, %v3235_v58 }
 0x269   :  { %v1315_v12 = vadd.f32 1.0, %v3246_v2  ;;  %2570 = vpow2.f32 %v1249_v53  ;;  %4291 = vst [vmem:[#allocation20_spill] sm:$0xff] %v3294_v31  ;;  %4292 = vst [vmem:[#allocation21_spill] sm:$0xff] %v3297_v33  ;;  %v1211_v41 = vsub.f32 0.0, %v1179_v15  ;;  %v3312_v45 = vadd.f32 %v988_v40, %v645_v48 }
 0x26a   :  { %4293 = vst [vmem:[#allocation22_spill] sm:$0xff] %v3300_v42  ;;  %2572 = vlog2.f32 %v1306_v24  ;;  %4294 = vst [vmem:[#allocation23_spill] sm:$0xff] %v3307_v19  ;;  %v3314_v13 = vpop.f32.mrf.mxu1  ;;  %v1301_v60 = vadd.f32 1.0, %v1300_v29  ;;  %v1303_v5 = vand.u32 2147483647, %v3208_v39  ;;  %v1318_v40 = vmul.f32 -0.5, %v3246_v2 }
 0x26b   :  { %v3302_v36 = vpop.eup %2558  ;;  %2574 = vlog2.f32 %v1315_v12  ;;  %4295 = vst [vmem:[#allocation24_spill] sm:$0xff] %v3312_v45  ;;  %v1310_v12 = vadd.f32 1.0, %v1309_v30  ;;  %v1253_v17 = vmul.f32 1.442695, %v1211_v41  ;;  %v1312_v14 = vand.u32 2147483647, %v3235_v58 }
 0x26c   :  { %v3309_v43 = vpop.eup %2560  ;;  %2576 = vpow2.f32 %v1251_v27  ;;  %v1324_v16 = vadd.f32 1.0, %v3302_v36  ;;  %v1180_v27 = vand.u32 2147483647, %v3312_v45  ;;  %v3328_v29 = vpop.f32.mrf.mxu1  ;;  %v1327_v59 = vmul.f32 -0.5, %v3302_v36 }
 0x26d   :  { %v1333_v48 = vadd.f32 1.0, %v3309_v43  ;;  %v3339_v30 = vmul.f32 %v3208_v39, %v1301_v60  ;;  %v1321_v41 = vand.u32 2147483647, %v3246_v2  ;;  %v3344_v15 = vadd.f32 %v3240_v61, %v3217_v51 }
 0x26e   :  { %2578 = vlog2.f32 %v1324_v16  ;;  %vm3348_vm2 = vcmp.lt.f32.partialorder %v1303_v5, 0.0004427343  ;;  %v1319_v53 = vadd.f32 1.0, %v1318_v40  ;;  %v1336_v46 = vmul.f32 -0.5, %v3309_v43  ;;  %v3358_v61 = vpop.f32.mrf.mxu1 }
 0x26f   :  { %v3330_v10 = vpop.eup %2562  ;;  %4296 = vst [vmem:[#allocation25_spill] sm:$0xff] %v3344_v15  ;;  %2580 = vlog2.f32 %v1333_v48  ;;  %v3355_v60 = vmul.f32 %v3235_v58, %v1310_v12  ;;  %v1212_v51 = vsub.f32 0.0, %v1180_v27  ;;  %v1328_v5 = vadd.f32 1.0, %v1327_v59 }
 0x270   :  { %v1342_v16 = vadd.f32 1.0, %v3330_v10  ;;  %2582 = vpow2.f32 %v1253_v17  ;;  %v1330_v54 = vand.u32 2147483647, %v3302_v36  ;;  %v1345_v40 = vmul.f32 -0.5, %v3330_v10 }
 0x271   :  { %v3336_v50 = vpop.eup %2564  ;;  %v1181_v12 = vand.u32 2147483647, %v3344_v15  ;;  %v3370_v17 = vadd.f32 %v3279_v3, %v3221_v56  ;;  %v3373_v59 = vmul.f32 %v3246_v2, %v1319_v53  ;;  %vm3375_vm3 = vcmp.lt.f32.partialorder %v1321_v41, 0.0004427343  ;;  %v1004_v2 = vpop.f32.mrf.mxu1 }
 0x272   :  { %v3346_v24 = vpop.eup %2566  ;;  %v1351_v48 = vadd.f32 1.0, %v3336_v50  ;;  %v1354_v39 = vmul.f32 -0.5, %v3336_v50  ;;  %v1337_v8 = vadd.f32 1.0, %v1336_v46  ;;  %v1339_v19 = vand.u32 2147483647, %v3309_v43 }
 0x273   :  { %v1360_v58 = vadd.f32 1.0, %v3346_v24  ;;  %4299 = vst [vmem:[#allocation26_spill] sm:$0xff] %v3370_v17  ;;  %v1255_v42 = vmul.f32 1.442695, %v1212_v51  ;;  %vm3380_vm4 = vcmp.lt.f32.partialorder %v1312_v14, 0.0004427343  ;;  %2584 = vlog2.f32 %v1342_v16 }
 0x274   :  { %v1348_v56 = vand.u32 2147483647, %v3330_v10  ;;  %v1213_v3 = vsub.f32 0.0, %v1181_v12  ;;  %v3386_v41 = vmul.f32 %v3302_v36, %v1328_v5  ;;  %2586 = vlog2.f32 %v1351_v48 }
 0x275   :  { %v2569_v63 = vpop.eup %2568  ;;  %v1182_v51 = vand.u32 2147483647, %v3370_v17  ;;  %v1346_v14 = vadd.f32 1.0, %v1345_v40  ;;  %2588 = vlog2.f32 %v1360_v58  ;;  %v3396_v16 = vadd.f32 %v3314_v13, %v3225_v62  ;;  %v1006_v58 = vpop.f32.mrf.mxu1 }
 0x276   :  { %v3363_v38 = vpop.eup %2570  ;;  %v1299_v31 = vmul.f32 0.6931472, %v2569_v63  ;;  %v1355_v63 = vadd.f32 1.0, %v1354_v39  ;;  %v3399_v36 = vmul.f32 %v3309_v43, %v1337_v8  ;;  %v1363_v5 = vmul.f32 -0.5, %v3346_v24 }
 0x277   :  { %v2573_v33 = vpop.eup %2572  ;;  %v1369_v46 = vadd.f32 1.0, %v3363_v38  ;;  %2590 = vpow2.f32 %v1255_v42  ;;  %v1257_v48 = vmul.f32 1.442695, %v1213_v3  ;;  %v1372_v40 = vmul.f32 -0.5, %v3363_v38 }
 0x278   :  { %v2575_v53 = vpop.eup %2574  ;;  %v1305_v12 = vsel %vm3348_vm2, %v3339_v30, %v1299_v31  ;;  %v1214_v39 = vsub.f32 0.0, %v1182_v51  ;;  %v1308_v26 = vmul.f32 0.6931472, %v2573_v33  ;;  %vm3406_vm6 = vcmp.lt.f32.partialorder %v1330_v54, 0.0004427343 }
 0x279   :  { %v3390_v22 = vpop.eup %2576  ;;  %v1317_v45 = vmul.f32 0.6931472, %v2575_v53  ;;  %v1357_v8 = vand.u32 2147483647, %v3336_v50  ;;  %2592 = vlog2.f32 %v1369_v46  ;;  %v3415_v31 = vmul.f32 %v3330_v10, %v1346_v14 }
 0x27a   :  { %v1378_v42 = vadd.f32 1.0, %v3390_v22  ;;  %v3418_v43 = vmul.f32 %v3336_v50, %v1355_v63  ;;  %v1259_v13 = vmul.f32 1.442695, %v1214_v39  ;;  %v1183_v33 = vand.u32 2147483647, %v3396_v16 }
 0x27b   :  { %v2579_v54 = vpop.eup %2578  ;;  %v4306_v47 = vmax.f32 %v3157_v20, 0.0  ;;  %vm3423_vm8 = vcmp.lt.f32.partialorder %v1339_v19, 0.0004427343  ;;  %v1364_v53 = vadd.f32 1.0, %v1363_v5  ;;  %2594 = vpow2.f32 %v1257_v48  ;;  %v1008_v19 = vpop.f32.mrf.mxu1 }
 0x27c   :  { %v3429_v10 = vadd.f32 %v3328_v29, %v3229_v44  ;;  %v2581_v46 = vpop.eup %2580  ;;  %v1323_v50 = vsel %vm3375_vm3, %v3373_v59, %v1317_v45  ;;  %v1366_v51 = vand.u32 2147483647, %v3346_v24  ;;  %v1373_v14 = vadd.f32 1.0, %v1372_v40 }
 0x27d   :  { %v1585_v30 = vadd.f32 %v1305_v12, %v4306_v47  ;;  %v1381_v63 = vmul.f32 -0.5, %v3390_v22  ;;  %v3436_v12 = vpop.eup %2582  ;;  %v1314_v5 = vsel %vm3380_vm4, %v3355_v60, %v1308_v26  ;;  %2596 = vlog2.f32 %v1378_v42  ;;  %v1012_v42 = vpop.f32.mrf.mxu1 }
 0x27e   :  { %v1184_v44 = vand.u32 2147483647, %v3429_v10  ;;  %v3444_v29 = vadd.f32 %v3358_v61, %v3233_v55  ;;  %v1326_v45 = vmul.f32 0.6931472, %v2579_v54  ;;  %2598 = vpow2.f32 %v1259_v13 }
 0x27f   :  { %v1215_v59 = vsub.f32 0.0, %v1183_v33  ;;  %v3447_v27 = vadd.f32 %v1004_v2, %v3244_v0  ;;  %v1617_v48 = vsel %vm1105_vm5, %v3157_v20, %v1585_v30  ;;  %v4309_v26 = vmax.f32 %v3167_v28, 0.0 }
 0x280   :  { %vm3455_vm9 = vcmp.lt.f32.partialorder %v1348_v56, 0.0004427343  ;;  %v3460_v55 = vmul.f32 %v3346_v24, %v1364_v53  ;;  %v1375_v61 = vand.u32 2147483647, %v3363_v38  ;;  %v4312_v0 = vmax.f32 %v3163_v25, 0.0  ;;  %v2585_v13 = vpop.eup %2584 }
 0x281   :  { %v1587_v32 = vadd.f32 %v1323_v50, %v4309_v26  ;;  %v1335_v40 = vmul.f32 0.6931472, %v2581_v46  ;;  %v1382_v39 = vadd.f32 1.0, %v1381_v63  ;;  %v1387_v20 = vadd.f32 1.0, %v3436_v12  ;;  %v2587_v47 = vpop.eup %2586 }
 0x282   :  { %v3465_v2 = vadd.f32 %v1314_v5, %v4312_v0  ;;  %v3469_v56 = vmul.f32 %v3363_v38, %v1373_v14  ;;  %v1216_v33 = vsub.f32 0.0, %v1184_v44  ;;  %v1185_v54 = vand.u32 2147483647, %v3444_v29  ;;  %v2589_v63 = vpop.eup %2588 }
 0x283   :  { %v3473_v24 = vadd.f32 %v1006_v58, %v3250_v18  ;;  %v3475_v30 = vadd.f32 -0.6931472, %v1617_v48  ;;  %v1332_v53 = vsel %vm3406_vm6, %v3386_v41, %v1326_v45  ;;  %v1261_v46 = vmul.f32 1.442695, %v1215_v59 }
 0x284   :  { %v1186_v50 = vand.u32 2147483647, %v3447_v27  ;;  %v1619_v38 = vsel %vm1107_vm7, %v3167_v28, %v1587_v32  ;;  %vm3485_vm10 = vcmp.lt.f32.partialorder %v1357_v8, 0.0004427343  ;;  %v1384_v18 = vand.u32 2147483647, %v3390_v22  ;;  %v3494_v41 = vpop.eup %2590 }
 0x285   :  { %v3492_v62 = vadd.f32 %v1008_v19, %v3254_v49  ;;  %v1341_v5 = vsel %vm3423_vm8, %v3399_v36, %v1335_v40  ;;  %v1344_v44 = vmul.f32 0.6931472, %v2585_v13  ;;  %vm3499_vm11 = vcmp.lt.f32.partialorder %v1366_v51, 0.0004427343  ;;  %v1014_v49 = vpop.f32.mrf.mxu1 }
 0x286   :  { %vm3503_vm12 = vcmp.lt.f32.partialorder %v1375_v61, 0.0004427343  ;;  %v3508_v45 = vmul.f32 %v3390_v22, %v1382_v39  ;;  %2600 = vlog2.f32 %v1387_v20  ;;  %v4319_v19 = vmax.f32 %v3174_v34, 0.0  ;;  %v2593_v48 = vpop.eup %2592 }
 0x287   :  { %v1263_v3 = vmul.f32 1.442695, %v1216_v33  ;;  %v1217_v36 = vsub.f32 0.0, %v1185_v54  ;;  %v1187_v51 = vand.u32 2147483647, %v3473_v24  ;;  %2602 = vpow2.f32 %v1261_v46 }
 0x288   :  { %v3512_v59 = vadd.f32 %v1332_v53, %v4319_v19  ;;  %v3515_v26 = vadd.f32 -0.6931472, %v1619_v38  ;;  %v1218_v32 = vsub.f32 0.0, %v1186_v50  ;;  %v3518_v61 = vadd.f32 %v1012_v42, %v3258_v21  ;;  %v3529_v13 = vpop.eup %2594 }
 0x289   :  { %v4321_v22 = vmax.f32 %v3176_v37, 0.0  ;;  %v1396_v40 = vadd.f32 1.0, %v3494_v41  ;;  %v1188_v39 = vand.u32 2147483647, %v3492_v62  ;;  %v3527_v20 = vadd.f32 %v1014_v49, %v3262_v6 }
 0x28a   :  { %4320 = vst [vmem:[#allocation27_spill] sm:$0xff] %v3518_v61  ;;  %v1350_v33 = vsel %vm3455_vm9, %v3415_v31, %v1344_v44  ;;  %v1353_v54 = vmul.f32 0.6931472, %v2587_v47  ;;  %v1362_v21 = vmul.f32 0.6931472, %v2589_v63  ;;  %v1390_v42 = vmul.f32 -0.5, %v3436_v12  ;;  %v2597_v6 = vpop.eup %2596 }
 0x28b   :  { %v3522_v0 = vadd.f32 %v1341_v5, %v4321_v22  ;;  %4322 = vst [vmem:[#allocation28_spill] sm:$0xff] %v3527_v20  ;;  %v1371_v53 = vmul.f32 0.6931472, %v2593_v48  ;;  %vm3535_vm13 = vcmp.lt.f32.partialorder %v1384_v18, 0.0004427343  ;;  %2604 = vpow2.f32 %v1263_v3  ;;  %v3543_v47 = vpop.eup %2598 }
 0x28c   :  { %v1265_v50 = vmul.f32 1.442695, %v1217_v36  ;;  %v1219_v38 = vsub.f32 0.0, %v1187_v51  ;;  %v1267_v60 = vmul.f32 1.442695, %v1218_v32  ;;  %2606 = vlog2.f32 %v1396_v40  ;;  %v1016_v32 = vpop.f32.mrf.mxu1 }
 0x28d   :  { %v1189_v31 = vand.u32 2147483647, %v3518_v61  ;;  %v1405_v63 = vadd.f32 1.0, %v3529_v13  ;;  %v1220_v18 = vsub.f32 0.0, %v1188_v39  ;;  %v1190_v44 = vand.u32 2147483647, %v3527_v20 }
 0x28e   :  { %v4325_v19 = vmax.f32 %v3188_v57, 0.0  ;;  %v1359_v36 = vsel %vm3485_vm10, %v3418_v43, %v1353_v54  ;;  %v1391_v51 = vadd.f32 1.0, %v1390_v42  ;;  %v1393_v48 = vand.u32 2147483647, %v3436_v12 }
 0x28f   :  { %v1368_v22 = vsel %vm3499_vm11, %v3460_v55, %v1362_v21  ;;  %v1377_v40 = vsel %vm3503_vm12, %v3469_v56, %v1371_v53  ;;  %2608 = vpow2.f32 %v1265_v50  ;;  %v1269_v39 = vmul.f32 1.442695, %v1219_v38  ;;  %v1018_v53 = vpop.f32.mrf.mxu1 }
 0x290   :  { %v3549_v3 = vadd.f32 %v1350_v33, %v4325_v19  ;;  %v1380_v33 = vmul.f32 0.6931472, %v2597_v6  ;;  %v1414_v19 = vadd.f32 1.0, %v3543_v47  ;;  %2610 = vpow2.f32 %v1267_v60 }
 0x291   :  { %v1221_v14 = vsub.f32 0.0, %v1189_v31  ;;  %v4326_v43 = vmax.f32 %v3194_v1, 0.0  ;;  %2612 = vlog2.f32 %v1405_v63  ;;  %v1271_v42 = vmul.f32 1.442695, %v1220_v18 }
 0x292   :  { %v1222_v5 = vsub.f32 0.0, %v1190_v44  ;;  %v4327_v55 = vmax.f32 %v3196_v11, 0.0  ;;  %vm3570_vm14 = vcmp.lt.f32.partialorder %v1393_v48, 0.0004427343  ;;  %v3576_v21 = vadd.f32 %v1016_v32, %v3267_v52 }
 0x293   :  { %v3564_v54 = vadd.f32 %v1359_v36, %v4326_v43  ;;  %v2601_v50 = vpop.eup %2600  ;;  %v4331_v38 = vmax.f32 %v3200_v23, 0.0  ;;  %v1392_v60 = vmul.f32 %v3436_v12, %v1391_v51  ;;  %v1399_v31 = vmul.f32 -0.5, %v3494_v41 }
 0x294   :  { %v3568_v28 = vadd.f32 %v1368_v22, %v4327_v55  ;;  %4330 = vst [vmem:[#allocation29_spill] sm:$0xff] %v3576_v21  ;;  %2614 = vpow2.f32 %v1269_v39  ;;  %v1386_v63 = vsel %vm3535_vm13, %v3508_v45, %v1380_v33  ;;  %v1273_v52 = vmul.f32 1.442695, %v1221_v14  ;;  %v3588_v44 = vpop.eup %2602  ;;  %v1022_v45 = vpop.f32.mrf.mxu1 }
 0x295   :  { %v3580_v6 = vadd.f32 %v1377_v40, %v4331_v38  ;;  %2616 = vlog2.f32 %v1414_v19  ;;  %v1402_v36 = vand.u32 2147483647, %v3494_v41  ;;  %v1408_v48 = vmul.f32 -0.5, %v3529_v13 }
 0x296   :  { %2618 = vpow2.f32 %v1271_v42  ;;  %v1275_v32 = vmul.f32 1.442695, %v1222_v5  ;;  %v1389_v12 = vmul.f32 0.6931472, %v2601_v50  ;;  %v1417_v51 = vmul.f32 -0.5, %v3543_v47 }
 0x297   :  { %4332 = vst [vmem:[#allocation30_spill] sm:$0xff] %v3580_v6  ;;  %v1191_v46 = vand.u32 2147483647, %v3576_v21  ;;  %v4333_v40 = vmax.f32 %v3206_v35, 0.0  ;;  %v1400_v33 = vadd.f32 1.0, %v1399_v31  ;;  %v1423_v42 = vadd.f32 1.0, %v3588_v44 }
 0x298   :  { %v3601_v43 = vpop.eup %2604  ;;  %v1411_v5 = vand.u32 2147483647, %v3529_v13  ;;  %2620 = vpow2.f32 %v1273_v52  ;;  %v3606_v55 = vadd.f32 %v1018_v53, %v3271_v7  ;;  %v1409_v50 = vadd.f32 1.0, %v1408_v48  ;;  %v1024_v52 = vpop.f32.mrf.mxu1  ;;  %v4345_v21 = vld [vmem:[#allocation17_spill] sm:$0xff] }
 0x299   :  { %v3597_v39 = vadd.f32 %v1386_v63, %v4333_v40  ;;  %v1426_v38 = vmul.f32 -0.5, %v3588_v44  ;;  %2622 = vpow2.f32 %v1275_v32  ;;  %v2607_v31 = vpop.eup %2606  ;;  %v1395_v40 = vsel %vm3570_vm14, %v1392_v60, %v1389_v12 }
 0x29a   :  { %4335 = vst [vmem:[#allocation32_spill] sm:$0xff] %v3606_v55  ;;  %vm3612_vm15 = vcmp.lt.f32.partialorder %v1402_v36, 0.0004427343  ;;  %v1418_v19 = vadd.f32 1.0, %v1417_v51  ;;  %v1223_v22 = vsub.f32 0.0, %v1191_v46  ;;  %v1401_v7 = vmul.f32 %v3494_v41, %v1400_v33  ;;  %v1026_v58 = vpop.f32.mrf.mxu1 }
 0x29b   :  { %4334 = vst [vmem:[#allocation31_spill] sm:$0xff] %v3597_v39  ;;  %v1420_v53 = vand.u32 2147483647, %v3543_v47  ;;  %v1432_v48 = vadd.f32 1.0, %v3601_v43  ;;  %vm3622_vm0 = vcmp.lt.f32.partialorder %v1411_v5, 0.0004427343  ;;  %2624 = vlog2.f32 %v1423_v42 }
 0x29c   :  { %v3620_v32 = vpop.eup %2608  ;;  %v1435_v60 = vmul.f32 -0.5, %v3601_v43  ;;  %v1192_v12 = vand.u32 2147483647, %v3606_v55  ;;  %v4340_v51 = vmax.f32 %v3238_v4, 0.0  ;;  %v1398_v33 = vmul.f32 0.6931472, %v2607_v31 }
 0x29d   :  { %v3629_v41 = vpop.eup %2610  ;;  %v3636_v63 = vmul.f32 %v3529_v13, %v1409_v50  ;;  %v1427_v5 = vadd.f32 1.0, %v1426_v38  ;;  %v3639_v42 = vmul.f32 %v3543_v47, %v1418_v19  ;;  %v1429_v8 = vand.u32 2147483647, %v3588_v44 }
 0x29e   :  { %v3633_v46 = vadd.f32 %v1395_v40, %v4340_v51  ;;  %v2613_v18 = vpop.eup %2612  ;;  %v1277_v36 = vmul.f32 1.442695, %v1223_v22  ;;  %v3643_v49 = vadd.f32 %v1022_v45, %v3275_v9  ;;  %vm3645_vm1 = vcmp.lt.f32.partialorder %v1420_v53, 0.0004427343 }
 0x29f   :  { %2626 = vlog2.f32 %v1432_v48  ;;  %v1441_v13 = vadd.f32 1.0, %v3620_v32  ;;  %v1444_v50 = vmul.f32 -0.5, %v3620_v32  ;;  %v1436_v19 = vadd.f32 1.0, %v1435_v60 }
 0x2a0   :  { %4341 = vst [vmem:[#allocation33_spill] sm:$0xff] %v3633_v46  ;;  %4342 = vst [vmem:[#allocation34_spill] sm:$0xff] %v3643_v49  ;;  %v1438_v22 = vand.u32 2147483647, %v3601_v43  ;;  %v1224_v45 = vsub.f32 0.0, %v1192_v12  ;;  %v1404_v40 = vsel %vm3612_vm15, %v1401_v7, %v1398_v33  ;;  %v3659_v48 = vmul.f32 %v3588_v44, %v1427_v5  ;;  %v1028_v12 = vpop.f32.mrf.mxu1  ;;  %v4346_v7 = vld [vmem:[#allocation24_spill] sm:$0xff] }
 0x2a1   :  { %v3652_v47 = vpop.eup %2614  ;;  %v1407_v53 = vmul.f32 0.6931472, %v2613_v18  ;;  %v1450_v51 = vadd.f32 1.0, %v3629_v41  ;;  %v1447_v38 = vand.u32 2147483647, %v3620_v32  ;;  %v1453_v60 = vmul.f32 -0.5, %v3629_v41 }
 0x2a2   :  { %v2617_v31 = vpop.eup %2616  ;;  %2628 = vpow2.f32 %v1277_v36  ;;  %v3667_v9 = vadd.f32 %v1024_v52, %v4345_v21  ;;  %v1445_v14 = vadd.f32 1.0, %v1444_v50  ;;  %v1459_v18 = vadd.f32 1.0, %v3652_v47 }
 0x2a3   :  { %v3662_v20 = vpop.eup %2618  ;;  %2630 = vlog2.f32 %v1441_v13  ;;  %v1462_v44 = vmul.f32 -0.5, %v3652_v47  ;;  %v4347_v33 = vmax.f32 %v4346_v7, 0.0  ;;  %v1416_v55 = vmul.f32 0.6931472, %v2617_v31  ;;  %v1032_v31 = vpop.f32.mrf.mxu1 }
 0x2a4   :  { %v3676_v61 = vmul.f32 %v3601_v43, %v1436_v19  ;;  %v1279_v46 = vmul.f32 1.442695, %v1224_v45  ;;  %vm1106_vm2 = vcmp.ne.f32.partialorder %v3163_v25, %v3163_v25  ;;  %v1413_v52 = vsel %vm3622_vm0, %v3636_v63, %v1407_v53 }
 0x2a5   :  { %v3673_v5 = vadd.f32 %v1404_v40, %v4347_v33  ;;  %v3680_v21 = vpop.eup %2620  ;;  %2632 = vlog2.f32 %v1450_v51  ;;  %v1456_v36 = vand.u32 2147483647, %v3629_v41  ;;  %v1468_v13 = vadd.f32 1.0, %v3662_v20 }
 0x2a6   :  { %vm1108_vm3 = vcmp.ne.f32.partialorder %v3174_v34, %v3174_v34  ;;  %v3689_v43 = vpop.eup %2622  ;;  %v1454_v50 = vadd.f32 1.0, %v1453_v60  ;;  %v1471_v19 = vmul.f32 -0.5, %v3662_v20  ;;  %2634 = vpow2.f32 %v1279_v46 }
 0x2a7   :  { %4348 = vst [vmem:[#allocation17_spill] sm:$0xff] %v3673_v5  ;;  %v1194_v45 = vand.u32 2147483647, %v3667_v9  ;;  %v3694_v56 = vmul.f32 %v3620_v32, %v1445_v14  ;;  %2636 = vlog2.f32 %v1459_v18  ;;  %v1463_v63 = vadd.f32 1.0, %v1462_v44  ;;  %v4351_v14 = vld [vmem:[#allocation18_spill] sm:$0xff]  ;;  %v4352_v44 = vld [vmem:[#allocation19_spill] sm:$0xff] }
 0x2a8   :  { %v1193_v40 = vand.u32 2147483647, %v3643_v49  ;;  %v1422_v53 = vsel %vm3645_vm1, %v3639_v42, %v1416_v55  ;;  %vm3700_vm4 = vcmp.lt.f32.partialorder %v1429_v8, 0.0004427343  ;;  %v1465_v46 = vand.u32 2147483647, %v3652_v47  ;;  %v2625_v4 = vpop.eup %2624 }
 0x2a9   :  { %v1477_v60 = vadd.f32 1.0, %v3680_v21  ;;  %v1226_v33 = vsub.f32 0.0, %v1194_v45  ;;  %2638 = vlog2.f32 %v1468_v13  ;;  %v1486_v32 = vadd.f32 1.0, %v3689_v43  ;;  %v1034_v45 = vpop.f32.mrf.mxu1  ;;  %v4361_v49 = vld [vmem:[#allocation20_spill] sm:$0xff] }
 0x2aa   :  { %v3708_v18 = vadd.f32 %v1026_v58, %v4351_v14  ;;  %v3711_v5 = vadd.f32 %v1028_v12, %v4352_v44  ;;  %v4353_v8 = vmax.f32 %v3344_v15, 0.0  ;;  %v3718_v55 = vmul.f32 %v3629_v41, %v1454_v50 }
 0x2ab   :  { %v1472_v42 = vadd.f32 1.0, %v1471_v19  ;;  %v1283_v39 = vmul.f32 1.442695, %v1226_v33  ;;  %vm3720_vm5 = vcmp.lt.f32.partialorder %v1438_v22, 0.0004427343  ;;  %v3725_v58 = vmul.f32 %v3652_v47, %v1463_v63  ;;  %v1036_v33 = vpop.f32.mrf.mxu1 }
 0x2ac   :  { %v3715_v6 = vadd.f32 %v1413_v52, %v4353_v8  ;;  %v1474_v12 = vand.u32 2147483647, %v3662_v20  ;;  %v1225_v44 = vsub.f32 0.0, %v1193_v40  ;;  %v2627_v52 = vpop.eup %2626  ;;  %v4357_v8 = vmax.f32 %v3370_v17, 0.0 }
 0x2ad   :  { %v1425_v50 = vmul.f32 0.6931472, %v2625_v4  ;;  %2640 = vlog2.f32 %v1477_v60  ;;  %v1480_v22 = vmul.f32 -0.5, %v3680_v21  ;;  %v1195_v19 = vand.u32 2147483647, %v3708_v18 }
 0x2ae   :  { %4354 = vst [vmem:[#allocation24_spill] sm:$0xff] %v3715_v6  ;;  %v3731_v41 = vadd.f32 %v1422_v53, %v4357_v8  ;;  %2642 = vlog2.f32 %v1486_v32  ;;  %v1196_v47 = vand.u32 2147483647, %v3711_v5  ;;  %v1618_v63 = vsel %vm1106_vm2, %v3163_v25, %v3465_v2  ;;  %v4362_v6 = vld [vmem:[#allocation21_spill] sm:$0xff] }
 0x2af   :  { %vm3741_vm6 = vcmp.lt.f32.partialorder %v1447_v38, 0.0004427343  ;;  %v3746_v4 = vmul.f32 %v3662_v20, %v1472_v42  ;;  %v1483_v53 = vand.u32 2147483647, %v3680_v21  ;;  %2644 = vpow2.f32 %v1283_v39  ;;  %v3754_v32 = vpop.eup %2628 }
 0x2b0   :  { %4358 = vst [vmem:[#allocation18_spill] sm:$0xff] %v3731_v41  ;;  %v1620_v60 = vsel %vm1108_vm3, %v3174_v34, %v3512_v59  ;;  %v3756_v25 = vmul.f32 0.6931472, %v2627_v52  ;;  %v1489_v2 = vmul.f32 -0.5, %v3689_v43  ;;  %v1281_v38 = vmul.f32 1.442695, %v1225_v44  ;;  %v2631_v20 = vpop.eup %2630 }
 0x2b1   :  { %v1228_v8 = vsub.f32 0.0, %v1196_v47  ;;  %v2310_v42 = vadd.f32 -0.6931472, %v1618_v63  ;;  %v2312_v14 = vadd.f32 -0.6931472, %v1620_v60  ;;  %v3760_v39 = vadd.f32 %v1032_v31, %v4361_v49  ;;  %v4363_v41 = vld [vmem:[#allocation22_spill] sm:$0xff] }
 0x2b2   :  { %v3763_v15 = vadd.f32 %v1034_v45, %v4362_v6  ;;  %v1431_v34 = vsel %vm3700_vm4, %v3659_v48, %v1425_v50  ;;  %v1227_v59 = vsub.f32 0.0, %v1195_v19  ;;  %v3769_v17 = vadd.f32 %v1036_v33, %v4363_v41  ;;  %v2633_v44 = vpop.eup %2632  ;;  %v1038_v19 = vpop.f32.mrf.mxu1 }
 0x2b3   :  { %v1287_v52 = vmul.f32 1.442695, %v1228_v8  ;;  %vm3771_vm7 = vcmp.lt.f32.partialorder %v1456_v36, 0.0004427343  ;;  %vm3775_vm8 = vcmp.lt.f32.partialorder %v1465_v46, 0.0004427343  ;;  %v1682_v45 = vpack.c.bf16 %v2312_v14, %v2310_v42  ;;  %v3781_v51 = vpop.eup %2634 }
 0x2b4   :  { %v1481_v31 = vadd.f32 1.0, %v1480_v22  ;;  %v1495_v6 = vadd.f32 1.0, %v3754_v32  ;;  %v1197_v48 = vand.u32 2147483647, %v3760_v39  ;;  %v1443_v50 = vmul.f32 0.6931472, %v2631_v20  ;;  %v2637_v46 = vpop.eup %2636 }
 0x2b5   :  { %v1492_v41 = vand.u32 2147483647, %v3689_v43  ;;  %2646 = vpow2.f32 %v1287_v52  ;;  %v1198_v36 = vand.u32 2147483647, %v3763_v15  ;;  %vm1112_vm9 = vcmp.ne.f32.partialorder %v3196_v11, %v3196_v11  ;;  %1933 = vmatprep.mubr.bf16.mxu0 %v1682_v45 }
 0x2b6   :  { %v4368_v22 = vmax.f32 %v3396_v16, 0.0  ;;  %v1440_v14 = vsel %vm3720_vm5, %v3676_v61, %v3756_v25  ;;  %vm3795_vm10 = vcmp.lt.f32.partialorder %v1474_v12, 0.0004427343  ;;  %v1490_v33 = vadd.f32 1.0, %v1489_v2  ;;  %v2639_v61 = vpop.eup %2638  ;;  %v4372_v2 = vld [vmem:[#allocation23_spill] sm:$0xff] }
 0x2b7   :  { %2648 = vpow2.f32 %v1281_v38  ;;  %vm1110_vm11 = vcmp.ne.f32.partialorder %v3188_v57, %v3188_v57  ;;  %v1285_v8 = vmul.f32 1.442695, %v1227_v59  ;;  %v1229_v20 = vsub.f32 0.0, %v1197_v48 }
 0x2b8   :  { %v3789_v63 = vadd.f32 %v1431_v34, %v4368_v22  ;;  %v4371_v42 = vpack.c.bf16 %v3515_v26, %v3475_v30  ;;  %v1230_v34 = vsub.f32 0.0, %v1198_v36  ;;  %v1199_v13 = vand.u32 2147483647, %v3769_v17 }
 0x2b9   :  { %v1452_v12 = vmul.f32 0.6931472, %v2633_v44  ;;  %2650 = vlog2.f32 %v1495_v6  ;;  %v1504_v25 = vadd.f32 1.0, %v3781_v51  ;;  %v3807_v38 = vadd.f32 %v1038_v19, %v4372_v2 }
 0x2ba   :  { %1934 = vmatmul.mubr.bf16.vlgmr.msra.gmra.mxu0 %v4371_v42  ;;  %v1449_v59 = vsel %vm3741_vm6, %v3694_v56, %v1443_v50  ;;  %v1461_v52 = vmul.f32 0.6931472, %v2637_v46  ;;  %v1291_v45 = vmul.f32 1.442695, %v1230_v34  ;;  %v1231_v48 = vsub.f32 0.0, %v1199_v13  ;;  %v2641_v56 = vpop.eup %2640 }
 0x2bb   :  { %vm1109_vm12 = vcmp.ne.f32.partialorder %v3176_v37, %v3176_v37  ;;  %v3815_v30 = vmul.f32 %v3680_v21, %v1481_v31  ;;  %vm3817_vm13 = vcmp.lt.f32.partialorder %v1483_v53, 0.0004427343  ;;  %v3822_v44 = vmul.f32 %v3689_v43, %v1490_v33  ;;  %v2643_v21 = vpop.eup %2642 }
 0x2bc   :  { %v1098_v6 = vmax.f32 %v3667_v9, 0.0  ;;  %v1289_v40 = vmul.f32 1.442695, %v1229_v20  ;;  %v1470_v50 = vmul.f32 0.6931472, %v2639_v61  ;;  %v1498_v36 = vmul.f32 -0.5, %v3754_v32 }
 0x2bd   :  { %2652 = vpow2.f32 %v1285_v8  ;;  %v1200_v19 = vand.u32 2147483647, %v3807_v38  ;;  %vm1111_vm14 = vcmp.ne.f32.partialorder %v3194_v1, %v3194_v1  ;;  %v4375_v53 = vmax.f32 %v3429_v10, 0.0  ;;  %v3841_v8 = vpop.eup %2644 }
 0x2be   :  { %v4376_v43 = vmax.f32 %v3444_v29, 0.0  ;;  %vm3837_vm15 = vcmp.lt.f32.partialorder %v1492_v41, 0.0004427343  ;;  %2654 = vlog2.f32 %v1504_v25  ;;  %v1293_v33 = vmul.f32 1.442695, %v1231_v48 }
 0x2bf   :  { %v3831_v31 = vadd.f32 %v1440_v14, %v4375_v53  ;;  %v1458_v20 = vsel %vm3771_vm7, %v3718_v55, %v1452_v12  ;;  %v1467_v14 = vsel %vm3775_vm8, %v3725_v58, %v1461_v52  ;;  %v1099_v42 = vmax.f32 %v3708_v18, 0.0 }
 0x2c0   :  { %v3835_v46 = vadd.f32 %v1449_v59, %v4376_v43  ;;  %2656 = vpow2.f32 %v1291_v45  ;;  %vm1114_vm0 = vcmp.ne.f32.partialorder %v3206_v35, %v3206_v35  ;;  %v1501_v41 = vand.u32 2147483647, %v3754_v32 }
 0x2c1   :  { %2658 = vpow2.f32 %v1289_v40  ;;  %v1232_v34 = vsub.f32 0.0, %v1200_v19  ;;  %v1624_v55 = vsel %vm1112_vm9, %v3196_v11, %v3568_v28  ;;  %v1476_v58 = vsel %vm3795_vm10, %v3746_v4, %v1470_v50  ;;  %v4395_v19 = vld [vmem:[#allocation29_spill] sm:$0xff] }
 0x2c2   :  { %v1479_v47 = vmul.f32 0.6931472, %v2641_v56  ;;  %v1499_v49 = vadd.f32 1.0, %v1498_v36  ;;  %v1622_v13 = vsel %vm1110_vm11, %v3188_v57, %v3549_v3  ;;  %v4379_v61 = vmax.f32 %v3447_v27, 0.0  ;;  %v3875_v59 = vpop.eup %2646 }
 0x2c3   :  { %v1488_v25 = vmul.f32 0.6931472, %v2643_v21  ;;  %v1522_v2 = vadd.f32 1.0, %v3841_v8  ;;  %2660 = vpow2.f32 %v1293_v33  ;;  %v1507_v11 = vmul.f32 -0.5, %v3781_v51 }
 0x2c4   :  { %v3868_v12 = vadd.f32 %v1458_v20, %v4379_v61  ;;  %v1100_v28 = vmax.f32 %v3711_v5, 0.0  ;;  %v1295_v4 = vmul.f32 1.442695, %v1232_v34  ;;  %v2316_v60 = vadd.f32 -0.6931472, %v1624_v55  ;;  %v3890_v56 = vpop.eup %2648  ;;  %v4386_v34 = vld [vmem:[#allocation16_spill] sm:$0xff] }
 0x2c5   :  { %vm1113_vm1 = vcmp.ne.f32.partialorder %v3200_v23, %v3200_v23  ;;  %v4380_v57 = vmax.f32 %v3473_v24, 0.0  ;;  %v4381_v52 = vmax.f32 %v3492_v62, 0.0  ;;  %v2314_v48 = vadd.f32 -0.6931472, %v1622_v13  ;;  %v4387_v13 = vld [vmem:[#allocation33_spill] sm:$0xff] }
 0x2c6   :  { %v1621_v40 = vsel %vm1109_vm12, %v3176_v37, %v3522_v0  ;;  %v1485_v50 = vsel %vm3817_vm13, %v3815_v30, %v1479_v47  ;;  %v1500_v36 = vmul.f32 %v3754_v32, %v1499_v49  ;;  %vm3896_vm2 = vcmp.lt.f32.partialorder %v1501_v41, 0.0004427343  ;;  %v2651_v0 = vpop.eup %2650 }
 0x2c7   :  { %v3879_v3 = vadd.f32 %v1467_v14, %v4380_v57  ;;  %v3883_v45 = vadd.f32 %v1476_v58, %v4381_v52  ;;  %v1540_v21 = vadd.f32 1.0, %v3875_v59  ;;  %2662 = vpow2.f32 %v1295_v4  ;;  %v4384_v14 = vld [vmem:[#allocation31_spill] sm:$0xff]  ;;  %v4390_v4 = vld [vmem:[#allocation28_spill] sm:$0xff] }
 0x2c8   :  { %v1510_v53 = vand.u32 2147483647, %v3781_v51  ;;  %2664 = vlog2.f32 %v1522_v2  ;;  %v1684_v43 = vpack.c.bf16 %v2316_v60, %v2314_v48  ;;  %v1623_v37 = vsel %vm1111_vm14, %v3194_v1, %v3564_v54  ;;  %v4388_v2 = vld [vmem:[#allocation27_spill] sm:$0xff] }
 0x2c9   :  { %v1494_v32 = vsel %vm3837_vm15, %v3822_v44, %v1488_v25  ;;  %v1508_v30 = vadd.f32 1.0, %v1507_v11  ;;  %v2313_v26 = vadd.f32 -0.6931472, %v1621_v40  ;;  %v2315_v33 = vadd.f32 -0.6931472, %v1623_v37  ;;  %v4385_v44 = vld [vmem:[#allocation17_spill] sm:$0xff] }
 0x2ca   :  { %v1513_v20 = vadd.f32 1.0, %v3890_v56  ;;  %2666 = vlog2.f32 %v1540_v21  ;;  %1943 = vmatprep.mubr.bf16.mxu0 %v1684_v43  ;;  %vm1116_vm3 = vcmp.ne.f32.partialorder %v4346_v7, %v4346_v7  ;;  %v1626_v1 = vsel %vm1114_vm0, %v3206_v35, %v4384_v14  ;;  %v3923_v55 = vpop.eup %2652 }
 0x2cb   :  { %v1516_v54 = vmul.f32 -0.5, %v3890_v56  ;;  %v1683_v22 = vpack.c.bf16 %v2315_v33, %v2313_v26  ;;  %v1628_v41 = vsel %vm1116_vm3, %v4346_v7, %v4385_v44  ;;  %vm1115_vm4 = vcmp.ne.f32.partialorder %v4386_v34, %v4386_v34  ;;  %v2655_v25 = vpop.eup %2654 }
 0x2cc   :  { %v1497_v58 = vmul.f32 0.6931472, %v2651_v0  ;;  %v2318_v47 = vadd.f32 -0.6931472, %v1626_v1  ;;  %v2320_v49 = vadd.f32 -0.6931472, %v1628_v41  ;;  %v1627_v61 = vsel %vm1115_vm4, %v4386_v34, %v4387_v13 }
 0x2cd   :  { %v4389_v35 = vmax.f32 %v4388_v2, 0.0  ;;  %v4391_v60 = vmax.f32 %v4390_v4, 0.0  ;;  %vm3935_vm5 = vcmp.lt.f32.partialorder %v1510_v53, 0.0004427343  ;;  %v1525_v52 = vmul.f32 -0.5, %v3841_v8  ;;  %1944 = vmatmul.mubr.bf16.gmra.mxu0 %v1683_v22  ;;  %v3940_v48 = vpop.eup %2656 }
 0x2ce   :  { %v1509_v40 = vmul.f32 %v3781_v51, %v1508_v30  ;;  %v1543_v21 = vmul.f32 -0.5, %v3875_v59  ;;  %v1686_v43 = vpack.c.bf16 %v2320_v49, %v2318_v47  ;;  %v3949_v53 = vpop.eup %2658  ;;  %v1517_v0 = vadd.f32 1.0, %v1516_v54 }
 0x2cf   :  { %v3929_v11 = vadd.f32 %v1485_v50, %v4389_v35  ;;  %v3933_v57 = vadd.f32 %v1494_v32, %v4391_v60  ;;  %v4394_v50 = vld [vmem:[#allocation30_spill] sm:$0xff]  ;;  %v1519_v32 = vand.u32 2147483647, %v3890_v56  ;;  %v1531_v26 = vadd.f32 1.0, %v3923_v55 }
 0x2d0   :  { %v1625_v37 = vsel %vm1113_vm1, %v3200_v23, %v4394_v50  ;;  %v2319_v33 = vadd.f32 -0.6931472, %v1627_v61  ;;  %v1503_v51 = vsel %vm3896_vm2, %v1500_v36, %v1497_v58  ;;  %v1506_v30 = vmul.f32 0.6931472, %v2655_v25  ;;  %1953 = vmatprep.mubr.bf16.mxu0 %v1686_v43  ;;  %v3956_v1 = vpop.eup %2660 }
 0x2d1   :  { %2668 = vlog2.f32 %v1513_v20  ;;  %v1558_v14 = vadd.f32 1.0, %v3940_v48  ;;  %v1526_v22 = vadd.f32 1.0, %v1525_v52  ;;  %v1528_v23 = vand.u32 2147483647, %v3841_v8 }
 0x2d2   :  { %v1534_v54 = vmul.f32 -0.5, %v3923_v55  ;;  %v2317_v44 = vadd.f32 -0.6931472, %v1625_v37  ;;  %v1544_v41 = vadd.f32 1.0, %v1543_v21  ;;  %v1546_v34 = vand.u32 2147483647, %v3875_v59 }
 0x2d3   :  { %v1549_v47 = vadd.f32 1.0, %v3949_v53  ;;  %v1104_v36 = vmax.f32 %v3807_v38, 0.0  ;;  %v4396_v20 = vmax.f32 %v4395_v19, 0.0  ;;  %v3968_v49 = vmul.f32 %v3890_v56, %v1517_v0  ;;  %v4399_v0 = vld [vmem:[#allocation26_spill] sm:$0xff] }
 0x2d4   :  { %2670 = vlog2.f32 %v1531_v26  ;;  %v1685_v13 = vpack.c.bf16 %v2319_v33, %v2317_v44  ;;  %v3970_v61 = vpop.eup %2662  ;;  %v1512_v25 = vsel %vm3935_vm5, %v1509_v40, %v1506_v30  ;;  %v1537_v35 = vand.u32 2147483647, %v3923_v55 }
 0x2d5   :  { %v3965_v58 = vadd.f32 %v1503_v51, %v4396_v20  ;;  %2672 = vlog2.f32 %v1558_v14  ;;  %v1567_v60 = vadd.f32 1.0, %v3956_v1  ;;  %v2665_v52 = vpop.eup %2664  ;;  %v3977_v21 = vmul.f32 %v3841_v8, %v1526_v22  ;;  %v4402_v8 = vld [vmem:[#allocation18_spill] sm:$0xff]  ;;  %v4403_v51 = vld [vmem:[#allocation32_spill] sm:$0xff] }
 0x2d6   :  { %vm3979_vm6 = vcmp.lt.f32.partialorder %v1528_v23, 0.0004427343  ;;  %v1535_v50 = vadd.f32 1.0, %v1534_v54  ;;  %v1576_v37 = vadd.f32 1.0, %v3970_v61  ;;  %1954 = vmatmul.mubr.bf16.gmra.mxu0 %v1685_v13  ;;  %vm1118_vm7 = vcmp.ne.f32.partialorder %v4399_v0, %v4399_v0  ;;  %v4406_v20 = vld [vmem:[#allocation24_spill] sm:$0xff] }
 0x2d7   :  { %v1545_v7 = vmul.f32 %v3875_v59, %v1544_v41  ;;  %vm3987_vm8 = vcmp.lt.f32.partialorder %v1546_v34, 0.0004427343  ;;  %2674 = vlog2.f32 %v1549_v47  ;;  %v1630_v26 = vsel %vm1118_vm7, %v4399_v0, %v4402_v8  ;;  %v2667_v33 = vpop.eup %2666  ;;  %v4405_v34 = vld [vmem:[#allocation25_spill] sm:$0xff] }
 0x2d8   :  { %v4404_v30 = vmax.f32 %v4403_v51, 0.0  ;;  %v3996_v22 = vmul.f32 -0.5, %v3949_v53  ;;  %2676 = vlog2.f32 %v1576_v37  ;;  %vm1120_vm9 = vcmp.ne.f32.partialorder %v3429_v10, %v3429_v10 }
 0x2d9   :  { %v1524_v59 = vmul.f32 0.6931472, %v2665_v52  ;;  %v1561_v23 = vmul.f32 -0.5, %v3940_v48  ;;  %2678 = vlog2.f32 %v1567_v60  ;;  %v1632_v54 = vsel %vm1120_vm9, %v3429_v10, %v3831_v31 }
 0x2da   :  { %v1608_v14 = vadd.f32 %v1512_v25, %v4404_v30  ;;  %v2322_v44 = vadd.f32 -0.6931472, %v1630_v26  ;;  %v2324_v41 = vadd.f32 -0.6931472, %v1632_v54  ;;  %vm1117_vm10 = vcmp.ne.f32.partialorder %v4405_v34, %v4405_v34 }
 0x2db   :  { %vm1119_vm11 = vcmp.ne.f32.partialorder %v3396_v16, %v3396_v16  ;;  %v1542_v47 = vmul.f32 0.6931472, %v2667_v33  ;;  %v1629_v13 = vsel %vm1117_vm10, %v4405_v34, %v4406_v20  ;;  %vm1122_vm12 = vcmp.ne.f32.partialorder %v3447_v27, %v3447_v27 }
 0x2dc   :  { %v1631_v25 = vsel %vm1119_vm11, %v3396_v16, %v3789_v63  ;;  %v1688_v60 = vpack.c.bf16 %v2324_v41, %v2322_v44  ;;  %v2321_v10 = vadd.f32 -0.6931472, %v1629_v13  ;;  %vm1124_vm13 = vcmp.ne.f32.partialorder %v3492_v62, %v3492_v62 }
 0x2dd   :  { %v2323_v31 = vadd.f32 -0.6931472, %v1631_v25  ;;  %v1564_v52 = vand.u32 2147483647, %v3940_v48  ;;  %v1579_v37 = vmul.f32 -0.5, %v3970_v61  ;;  %v1634_v0 = vsel %vm1122_vm12, %v3447_v27, %v3868_v12 }
 0x2de   :  { %v1636_v8 = vsel %vm1124_vm13, %v3492_v62, %v3883_v45  ;;  %v2669_v16 = vpop.eup %2668  ;;  %1963 = vmatprep.mubr.bf16.mxu0 %v1688_v60  ;;  %v2326_v26 = vadd.f32 -0.6931472, %v1634_v0  ;;  %vm1123_vm14 = vcmp.ne.f32.partialorder %v3473_v24, %v3473_v24  ;;  %v1530_v30 = vsel %vm3979_vm6, %v3977_v21, %v1524_v59 }
 0x2df   :  { %v1687_v63 = vpack.c.bf16 %v2323_v31, %v2321_v10  ;;  %v2328_v33 = vadd.f32 -0.6931472, %v1636_v8  ;;  %vm4026_vm15 = vcmp.lt.f32.partialorder %v1537_v35, 0.0004427343  ;;  %v1548_v27 = vsel %vm3987_vm8, %v1545_v7, %v1542_v47 }
 0x2e0   :  { %v1562_v62 = vadd.f32 1.0, %v1561_v23  ;;  %v1635_v12 = vsel %vm1123_vm14, %v3473_v24, %v3879_v3  ;;  %vm1121_vm0 = vcmp.ne.f32.partialorder %v3444_v29, %v3444_v29  ;;  %vm1126_vm1 = vcmp.ne.f32.partialorder %v4390_v4, %v4390_v4 }
 0x2e1   :  { %1964 = vmatmul.mubr.bf16.gmra.mxu0 %v1687_v63  ;;  %v1690_v45 = vpack.c.bf16 %v2328_v33, %v2326_v26  ;;  %vm1128_vm2 = vcmp.ne.f32.partialorder %v4403_v51, %v4403_v51  ;;  %v2671_v35 = vpop.eup %2670  ;;  %vm4042_vm3 = vcmp.lt.f32.partialorder %v1519_v32, 0.0004427343  ;;  %v1580_v43 = vadd.f32 1.0, %v1579_v37 }
 0x2e2   :  { %v1633_v24 = vsel %vm1121_vm0, %v3444_v29, %v3835_v46  ;;  %v1638_v3 = vsel %vm1126_vm1, %v4390_v4, %v3933_v57  ;;  %v1640_v7 = vsel %vm1128_vm2, %v4403_v51, %v1608_v14  ;;  %v2673_v40 = vpop.eup %2672  ;;  %v1515_v59 = vmul.f32 0.6931472, %v2669_v16 }
 0x2e3   :  { %v1536_v23 = vmul.f32 %v3923_v55, %v1535_v50  ;;  %1973 = vmatprep.mubr.bf16.mxu0 %v1690_v45  ;;  %v2327_v44 = vadd.f32 -0.6931472, %v1635_v12  ;;  %v2332_v56 = vadd.f32 -0.6931472, %v1640_v7  ;;  %v1612_v32 = vadd.f32 %v1548_v27, %v1100_v28 }
 0x2e4   :  { %vm4054_vm4 = vcmp.lt.f32.partialorder %v1564_v52, 0.0004427343  ;;  %v1582_v29 = vand.u32 2147483647, %v3970_v61  ;;  %v2330_v46 = vadd.f32 -0.6931472, %v1638_v3  ;;  %v2675_v4 = vpop.eup %2674  ;;  %v1610_v57 = vadd.f32 %v1530_v30, %v1098_v6 }
 0x2e5   :  { %v1533_v51 = vmul.f32 0.6931472, %v2671_v35  ;;  %v1570_v55 = vmul.f32 -0.5, %v3956_v1  ;;  %v2325_v50 = vadd.f32 -0.6931472, %v1633_v24  ;;  %v2677_v14 = vpop.eup %2676  ;;  %v1563_v47 = vmul.f32 %v3940_v48, %v1562_v62 }
 0x2e6   :  { %v1560_v34 = vmul.f32 0.6931472, %v2673_v40  ;;  %v1581_v28 = vmul.f32 %v3970_v61, %v1580_v43  ;;  %v1692_v20 = vpack.c.bf16 %v2332_v56, %v2330_v46  ;;  %v2679_v13 = vpop.eup %2678  ;;  %v1578_v25 = vmul.f32 0.6931472, %v2677_v14 }
 0x2e7   :  { %v1689_v60 = vpack.c.bf16 %v2327_v44, %v2325_v50  ;;  %vm1127_vm5 = vcmp.ne.f32.partialorder %v4395_v19, %v4395_v19  ;;  %vm1132_vm6 = vcmp.ne.f32.partialorder %v3711_v5, %v3711_v5  ;;  %vm4068_vm7 = vcmp.lt.f32.partialorder %v1582_v29, 0.0004427343  ;;  %v4131_v50 = vpop.permute.xlu1 %2107 }
 0x2e8   :  { %v1639_v10 = vsel %vm1127_vm5, %v4395_v19, %v3965_v58  ;;  %vm1130_vm8 = vcmp.ne.f32.partialorder %v3667_v9, %v3667_v9  ;;  %v1644_v48 = vsel %vm1132_vm6, %v3711_v5, %v1612_v32  ;;  %v1539_v61 = vsel %vm4026_vm15, %v1536_v23, %v1533_v51 }
 0x2e9   :  { %v1584_v31 = vsel %vm4068_vm7, %v1581_v28, %v1578_v25  ;;  %1974 = vmatmul.mubr.bf16.gmra.mxu0 %v1689_v60  ;;  %vm1125_vm9 = vcmp.ne.f32.partialorder %v4388_v2, %v4388_v2  ;;  %v1642_v52 = vsel %vm1130_vm8, %v3667_v9, %v1610_v57  ;;  %v1566_v19 = vsel %vm4054_vm4, %v1563_v47, %v1560_v34 }
 0x2ea   :  { %v1571_v58 = vadd.f32 1.0, %v1570_v55  ;;  %1983 = vmatprep.mubr.bf16.mxu0 %v1692_v20  ;;  %v1637_v5 = vsel %vm1125_vm9, %v4388_v2, %v3929_v11  ;;  %v2336_v37 = vadd.f32 -0.6931472, %v1644_v48  ;;  %v1521_v0 = vsel %vm4042_vm3, %v3968_v49, %v1515_v59  ;;  %v4415_v49 = vld [vmem:[#allocation34_spill] sm:$0xff]  ;;  %v4129_v55 = vpop.permute.xlu0 %2102 }
 0x2eb   :  { %v1102_v8 = vmax.f32 %v3763_v15, 0.0  ;;  %v1616_v16 = vadd.f32 %v1584_v31, %v1104_v36  ;;  %v2331_v63 = vadd.f32 -0.6931472, %v1639_v10  ;;  %v1611_v9 = vadd.f32 %v1539_v61, %v1099_v42  ;;  %v4135_v34 = vpop.permute.xlu1 %2097  ;;  %v1729_v48 = vld [vmem:[%s4260_s11] sm:$0x3]  ;;  %v4420_v61 = vld [vmem:[#allocation15_spill] sm:$0xff] }
 0x2ec   :  { %v1555_v26 = vand.u32 2147483647, %v3949_v53  ;;  %v1573_v33 = vand.u32 2147483647, %v3956_v1  ;;  %v2334_v30 = vadd.f32 -0.6931472, %v1642_v52  ;;  %v1572_v45 = vmul.f32 %v3956_v1, %v1571_v58 }
 0x2ed   :  { %v1553_v2 = vadd.f32 1.0, %v3996_v22  ;;  %v1614_v11 = vadd.f32 %v1566_v19, %v1102_v8  ;;  %v1569_v54 = vmul.f32 0.6931472, %v2679_v13  ;;  %v2329_v27 = vadd.f32 -0.6931472, %v1637_v5 }
 0x2ee   :  { %v4416_v62 = vmax.f32 %v4415_v49, 0.0  ;;  %v1694_v36 = vpack.c.bf16 %v2336_v37, %v2334_v30  ;;  %vm1136_vm10 = vcmp.ne.f32.partialorder %v3807_v38, %v3807_v38  ;;  %v1551_v42 = vmul.f32 0.6931472, %v2675_v4  ;;  %v4133_v14 = vpop.permute.xlu0 %2092 }
 0x2ef   :  { %v1691_v35 = vpack.c.bf16 %v2331_v63, %v2329_v27  ;;  %vm1131_vm11 = vcmp.ne.f32.partialorder %v3708_v18, %v3708_v18  ;;  %v1648_v21 = vsel %vm1136_vm10, %v3807_v38, %v1616_v16  ;;  %vm4107_vm12 = vcmp.lt.f32.partialorder %v1573_v33, 0.0004427343  ;;  %v4139_v47 = vpop.permute.xlu1 %2087 }
 0x2f0   :  { %v1609_v12 = vadd.f32 %v1521_v0, %v4416_v62  ;;  %v1643_v43 = vsel %vm1131_vm11, %v3708_v18, %v1611_v9  ;;  %vm1134_vm13 = vcmp.ne.f32.partialorder %v3763_v15, %v3763_v15  ;;  %v1554_v1 = vmul.f32 %v3949_v53, %v1553_v2 }
 0x2f1   :  { %v1575_v24 = vsel %vm4107_vm12, %v1572_v45, %v1569_v54  ;;  %1984 = vmatmul.mubr.bf16.gmra.mxu0 %v1691_v35  ;;  %vm1129_vm14 = vcmp.ne.f32.partialorder %v4415_v49, %v4415_v49  ;;  %v1646_v38 = vsel %vm1134_vm13, %v3763_v15, %v1614_v11  ;;  %vm1556_vm15 = vcmp.lt.f32.partialorder %v1555_v26, 0.0004427343 }
 0x2f2   :  { %v1103_v3 = vmax.f32 %v3769_v17, 0.0  ;;  %1993 = vmatprep.mubr.bf16.mxu0 %v1694_v36  ;;  %v1641_v18 = vsel %vm1129_vm14, %v4415_v49, %v1609_v12  ;;  %v2340_v7 = vadd.f32 -0.6931472, %v1648_v21  ;;  %v1557_v40 = vsel %vm1556_vm15, %v1554_v1, %v1551_v42 }
 0x2f3   :  { %v2335_v59 = vadd.f32 -0.6931472, %v1643_v43  ;;  %v1101_v53 = vmax.f32 %v3760_v39, 0.0  ;;  %v2338_v44 = vadd.f32 -0.6931472, %v1646_v38  ;;  %vm1135_vm0 = vcmp.ne.f32.partialorder %v3769_v17, %v3769_v17  ;;  %v4143_v20 = vpop.permute.xlu1 %2077 }
 0x2f4   :  { %v1615_v23 = vadd.f32 %v1575_v24, %v1103_v3  ;;  %v2333_v56 = vadd.f32 -0.6931472, %v1641_v18  ;;  %vm1133_vm1 = vcmp.ne.f32.partialorder %v3760_v39, %v3760_v39  ;;  %vm2778_vm2 = vmmov 0  }
 0x2f5   :  { %v1613_v32 = vadd.f32 %v1557_v40, %v1101_v53  ;;  %v1696_v41 = vpack.c.bf16 %v2340_v7, %v2338_v44  ;;  %v4421_v31 = vsub.s32 1, %v4420_v61  ;;  %v4422_v58 = vsub.s32 0, %v4420_v61 }
 0x2f6   :  { %v1693_v29 = vpack.c.bf16 %v2335_v59, %v2333_v56  ;;  %v1647_v15 = vsel %vm1135_vm0, %v3769_v17, %v1615_v23  ;;  %v4137_v17 = vpop.permute.xlu0 %2082 }
 0x2f7   :  { %v1645_v46 = vsel %vm1133_vm1, %v3760_v39, %v1613_v32  ;;  %v2339_v4 = vadd.f32 -0.6931472, %v1647_v15  ;;  %v4419_v39 = vmov 0.0   ;;  %v4148_v25 = vpop.permute.xlu1 %2067  ;;  %v4155_v52 = vrot.slane %v1729_v48, %v4421_v31 }
 0x2f8   :  { %v2337_v57 = vadd.f32 -0.6931472, %v1645_v46  ;;  %2428 = vmatprep.mubr.msk.bf16.mxu1 %vm2778_vm2, %v4419_v39  ;;  %v4159_v5 = vrot.slane %v1729_v48, %v4422_v58 }
 0x2f9   :  { %1994 = vmatmul.mubr.bf16.gmra.mxu0 %v1693_v29 }
 0x2fa   :  { %2003 = vmatprep.mubr.bf16.mxu0 %v1696_v41  ;;  %v1695_v51 = vpack.c.bf16 %v2339_v4, %v2337_v57  ;;  %v4141_v28 = vpop.permute.xlu0 %2072 }
 0x2fb   :  { %v2058_v6 = vpop.permute.xlu1 %2057 }
 0x2fe   :  { %v4146_v13 = vpop.permute.xlu0 %2062 }
 0x2ff   :  { %v2048_v37 = vpop.permute.xlu1 %2047 }
 0x301   :  { %2004 = vmatmul.mubr.bf16.gmra.mxu0 %v1695_v51 }
 0x302   :  { %v2053_v60 = vpop.permute.xlu0 %2052 }
 0x303   :  { %v2038_v11 = vpop.permute.xlu1 %2037 }
 0x306   :  { %v2043_v10 = vpop.permute.xlu0 %2042 }
 0x30a   :  { %v2033_v16 = vpop.permute.xlu0 %2032 }
 0x37a   :  { %v1935_v19 = vpop.f32.mrf.mxu0 }
 0x37b   :  { %v1936_v9 = vadd.f32 %v1935_v19, %v4159_v5 }
 0x37c   :  { %v1937_v0 = vpop.f32.mrf.mxu0 }
 0x37d   :  { %v1938_v8 = vadd.f32 %v1937_v0, %v4155_v52 }
 0x37e   :  { %v1939_v63 = vpop.f32.mrf.mxu0 }
 0x37f   :  { %v2110_v26 = vmul.f32 %v2033_v16, %v1938_v8  ;;  %v1940_v54 = vadd.f32 %v1939_v63, %v4159_v5 }
 0x380   :  { %v1941_v33 = vpop.f32.mrf.mxu0 }
 0x381   :  { %v4163_v30 = vmul.f32 %v2110_v26, %v1936_v9  ;;  %v1942_v2 = vadd.f32 %v1941_v33, %v4155_v52 }
 0x383   :  { %v2111_v27 = vmul.f32 %v2038_v11, %v1942_v2 }
 0x385   :  { %v4167_v49 = vmul.f32 %v2111_v27, %v1940_v54 }
 0x387   :  { %v2143_v62 = vpack.c.bf16 %v4167_v49, %v4163_v30 }
 0x38d   :  { %v1945_v12 = vpop.f32.mrf.mxu0 }
 0x38e   :  { %v1946_v35 = vadd.f32 %v1945_v12, %v4159_v5 }
 0x38f   :  { %v1947_v45 = vpop.f32.mrf.mxu0 }
 0x390   :  { %v1948_v36 = vadd.f32 %v1947_v45, %v4155_v52 }
 0x391   :  { %v1949_v42 = vpop.f32.mrf.mxu0 }
 0x392   :  { %v2112_v21 = vmul.f32 %v2043_v10, %v1948_v36  ;;  %v1950_v38 = vadd.f32 %v1949_v42, %v4159_v5 }
 0x393   :  { %v1951_v22 = vpop.f32.mrf.mxu0 }
 0x394   :  { %v4173_v43 = vmul.f32 %v2112_v21, %v1946_v35  ;;  %v1952_v1 = vadd.f32 %v1951_v22, %v4155_v52 }
 0x396   :  { %v1955_v24 = vpop.f32.mrf.mxu0  ;;  %v2113_v3 = vmul.f32 %v2048_v37, %v1952_v1 }
 0x397   :  { %v1956_v23 = vadd.f32 %v1955_v24, %v4159_v5 }
 0x398   :  { %v1957_v18 = vpop.f32.mrf.mxu0  ;;  %v4177_v7 = vmul.f32 %v2113_v3, %v1950_v38 }
 0x399   :  { %v1958_v40 = vadd.f32 %v1957_v18, %v4155_v52 }
 0x39a   :  { %v1959_v59 = vpop.f32.mrf.mxu0  ;;  %v2144_v53 = vpack.c.bf16 %v4177_v7, %v4173_v43 }
 0x39b   :  { %v2114_v44 = vmul.f32 %v2053_v60, %v1958_v40  ;;  %v1960_v29 = vadd.f32 %v1959_v59, %v4159_v5 }
 0x39c   :  { %v1961_v56 = vpop.f32.mrf.mxu0 }
 0x39d   :  { %v4183_v32 = vmul.f32 %v2114_v44, %v1956_v23  ;;  %v1962_v41 = vadd.f32 %v1961_v56, %v4155_v52 }
 0x39f   :  { %v2115_v15 = vmul.f32 %v2058_v6, %v1962_v41 }
 0x3a1   :  { %v4187_v46 = vpop.f32.mrf.mxu0  ;;  %v4189_v4 = vmul.f32 %v2115_v15, %v1960_v29 }
 0x3a3   :  { %v1967_v57 = vpop.f32.mrf.mxu0  ;;  %v2145_v51 = vpack.c.bf16 %v4189_v4, %v4183_v32  ;;  %v2142_v32 = vld [vmem:[#allocation11] sm:$0xff] }
 0x3a5   :  { %v1969_v10 = vpop.f32.mrf.mxu0 }
 0x3a7   :  { %v1971_v48 = vpop.f32.mrf.mxu0 }
 0x3a9   :  { %v1975_v31 = vpop.f32.mrf.mxu0 }
 0x3ab   :  { %v1977_v60 = vpop.f32.mrf.mxu0 }
 0x3ac   :  { %v1978_v41 = vadd.f32 %v1977_v60, %v4155_v52 }
 0x3ad   :  { %v1979_v19 = vpop.f32.mrf.mxu0 }
 0x3ae   :  { %v2118_v60 = vmul.f32 %v4141_v28, %v1978_v41  ;;  %v1966_v28 = vadd.f32 %v4187_v46, %v4159_v5 }
 0x3af   :  { %v1981_v58 = vpop.f32.mrf.mxu0 }
 0x3b0   :  { %v1982_v59 = vadd.f32 %v1981_v58, %v4155_v52 }
 0x3b1   :  { %v1985_v37 = vpop.f32.mrf.mxu0 }
 0x3b2   :  { %v2119_v58 = vmul.f32 %v4143_v20, %v1982_v59 }
 0x3b3   :  { %v1987_v0 = vpop.f32.mrf.mxu0 }
 0x3b4   :  { %v1988_v38 = vadd.f32 %v1987_v0, %v4155_v52 }
 0x3b5   :  { %v1989_v8 = vpop.f32.mrf.mxu0 }
 0x3b6   :  { %v1990_v29 = vadd.f32 %v1989_v8, %v4159_v5  ;;  %v1976_v8 = vadd.f32 %v1975_v31, %v4159_v5 }
 0x3b7   :  { %v1991_v16 = vpop.f32.mrf.mxu0 }
 0x3b8   :  { %v1992_v35 = vadd.f32 %v1991_v16, %v4155_v52 }
 0x3b9   :  { %v1995_v63 = vpop.f32.mrf.mxu0 }
 0x3ba   :  { %v2121_v23 = vmul.f32 %v4139_v47, %v1992_v35  ;;  %v1986_v47 = vadd.f32 %v1985_v37, %v4159_v5 }
 0x3bb   :  { %v1997_v6 = vpop.f32.mrf.mxu0 }
 0x3bc   :  { %v1998_v45 = vadd.f32 %v1997_v6, %v4155_v52  ;;  %v2137_v0 = vmul.f32 %v2121_v23, %v1990_v29 }
 0x3bd   :  { %v1999_v9 = vpop.f32.mrf.mxu0 }
 0x3be   :  { %v2122_v3 = vmul.f32 %v4133_v14, %v1998_v45  ;;  %v2000_v18 = vadd.f32 %v1999_v9, %v4159_v5  ;;  %v1972_v14 = vadd.f32 %v1971_v48, %v4155_v52 }
 0x3bf   :  { %v2001_v26 = vpop.f32.mrf.mxu0 }
 0x3c0   :  { %v2002_v27 = vadd.f32 %v2001_v26, %v4155_v52  ;;  %v2117_v48 = vmul.f32 %v4148_v25, %v1972_v14  ;;  %v1970_v26 = vadd.f32 %v1969_v10, %v4159_v5 }
 0x3c1   :  { %v2005_v33 = vpop.f32.mrf.mxu0 }
 0x3c2   :  { %v2123_v21 = vmul.f32 %v4135_v34, %v2002_v27  ;;  %v2006_v22 = vadd.f32 %v2005_v33, %v4159_v5  ;;  %v1996_v34 = vadd.f32 %v1995_v63, %v4159_v5  ;;  %v1968_v63 = vadd.f32 %v1967_v57, %v4155_v52 }
 0x3c3   :  { %v2007_v2 = vpop.f32.mrf.mxu0  ;;  %v2133_v57 = vmul.f32 %v2117_v48, %v1970_v26 }
 0x3c4   :  { %v2008_v11 = vadd.f32 %v2007_v2, %v4155_v52  ;;  %v2139_v44 = vmul.f32 %v2123_v21, %v2000_v18  ;;  %v2138_v15 = vmul.f32 %v2122_v3, %v1996_v34  ;;  %v2116_v37 = vmul.f32 %v4146_v13, %v1968_v63  ;;  %v2243_v13 = vld [vmem:[%s233_s9] ss:$0 sm:$0xff] }
 0x3c5   :  { %v2009_v54 = vpop.f32.mrf.mxu0  ;;  %vm285_vm3 = vcmp.eq.s32.totalorder %v4420_v61, %v2243_v13 }
 0x3c6   :  { %v2124_v36 = vmul.f32 %v4129_v55, %v2008_v11  ;;  %v2010_v1 = vadd.f32 %v2009_v54, %v4159_v5  ;;  %v2149_v16 = vpack.c.bf16 %v2139_v44, %v2138_v15  ;;  %v2132_v33 = vmul.f32 %v2116_v37, %v1966_v28  ;;  %vm2373_vm4 = vmpackc.low %vm285_vm3, %vm285_vm3 }
 0x3c7   :  { %v2011_v12 = vpop.f32.mrf.mxu0 }
 0x3c8   :  { %v2012_v42 = vadd.f32 %v2011_v12, %v4155_v52  ;;  %v2140_v40 = vmul.f32 %v2124_v36, %v2006_v22  ;;  %v2134_v52 = vmul.f32 %v2118_v60, %v1976_v8  ;;  %v2146_v25 = vpack.c.bf16 %v2133_v57, %v2132_v33 }
 0x3ca   :  { %v2125_v24 = vmul.f32 %v4131_v50, %v2012_v42  ;;  %v2120_v50 = vmul.f32 %v4137_v17, %v1988_v38  ;;  %v1980_v17 = vadd.f32 %v1979_v19, %v4159_v5  ;;  %v2779_v5 = vmov 1.0|1.0  }
 0x3cc   :  { %v2141_v55 = vmul.f32 %v2125_v24, %v2010_v1  ;;  %v2136_v6 = vmul.f32 %v2120_v50, %v1986_v47  ;;  %v2135_v9 = vmul.f32 %v2119_v58, %v1980_v17 }
 0x3ce   :  { %v2150_v56 = vpack.c.bf16 %v2141_v55, %v2140_v40  ;;  %v2148_v20 = vpack.c.bf16 %v2137_v0, %v2136_v6  ;;  %v2147_v19 = vpack.c.bf16 %v2135_v9, %v2134_v52 }
 0x3d0   :  { %2413 = vmatpush3.bf16.msra.mxu1 %v2150_v56 }
 0x3d1   :  { %2414 = vmatprep.subr.bf16.mxu1 %v4419_v39 }
 0x3d4   :  { %2415 = vmatpush3.bf16.msra.mxu1 %v2149_v16 }
 0x3d5   :  { %2416 = vmatprep.subr.bf16.mxu1 %v4419_v39 }
 0x3d8   :  { %2417 = vmatpush3.bf16.msra.mxu1 %v2148_v20 }
 0x3d9   :  { %2418 = vmatprep.subr.bf16.mxu1 %v4419_v39 }
 0x3dc   :  { %2419 = vmatpush3.bf16.msra.mxu1 %v2147_v19 }
 0x3dd   :  { %2420 = vmatprep.subr.bf16.mxu1 %v4419_v39 }
 0x3e0   :  { %2421 = vmatpush3.bf16.msra.mxu1 %v2146_v25 }
 0x3e1   :  { %2422 = vmatprep.subr.bf16.mxu1 %v4419_v39 }
 0x3e4   :  { %2423 = vmatpush3.bf16.msra.mxu1 %v2145_v51 }
 0x3e5   :  { %2424 = vmatprep.subr.bf16.mxu1 %v4419_v39 }
 0x3e8   :  { %2425 = vmatpush3.bf16.msra.mxu1 %v2144_v53 }
 0x3e9   :  { %2426 = vmatprep.subr.bf16.mxu1 %v4419_v39 }
 0x3ec   :  { %2427 = vmatpush3.bf16.msra.mxu1 %v2143_v62 }
 0x3ef   :  { %2429 = vmatmul.mubr.msk.bf16.vlgmr.msra.gmra.mxu1 %vm2373_vm4, %v2779_v5 }
 0x4af   :  { %v2185_v46 = vpop.f32.mrf.mxu1 }
 0x4b0   :  { %v2191_v4 = vadd.f32 %v2185_v46, %v2142_v32 }
 0x4b1   :  { %v2430_v51 = vpop.f32.mrf.mxu1 }
 0x4b2   :  { %2192 = vst [vmem:[#allocation11] sm:$0xff] %v2191_v4 }
 0x4b3   :  { %v2188_v10 = vpop.f32.mrf.mxu1 }
 0x4b5   :  { %v2431_v31 = vpop.f32.mrf.mxu1 }
 0x4b6 PF:  { %s2780_s4 = smov [#allocation11]  }
 0x4b7   :  { %s2199_s23 = sshll.u32 %s2780_s4, 4  ;;  %s2200_s23 = int_to_ptr.vmem [resolvable:$true] %s2199_s23 }
 0x4b8   :  { %s2742_s9 = scalar_lea.vmem %s2200_s23, 128  ;;  %p2747_p12 = scmp.lt.s32.totalorder %s2200_s23, %s2200_s23 }
 0x4b9   :  { %p2743_p11 = scmp.ne.s32.totalorder %s2200_s23, %s2742_s9  ;;  %p2748_p13 = scmp.lt.s32.totalorder %s2742_s9, %s2742_s9 }
 0x4bb   :  { %p2749_p0 = por %p2748_p13, %p2747_p12 }
 0x4bd   :  { %p2750_p1 = pnand %p2749_p0, %p2743_p11 }
 0x4bf   :  { %2753 = shalt.err (!%p2750_p1)
}
 0x4c0   :  { %2202 = dma.vmem_to_hbm [thread:$0]  %s2200_s23, 128, %s4261_s12, [#allocation7]  }
 0x4c1   :  { %2766 = dma.done.wait [#allocation7], 128  }
 0x4c2   :  { %2767 = vsyncadd [#allocation7], 4294967168 }
 0x4c3   :  { %2206 = vsyncpa [#allocation6], 1 }
 0x4c4   :  { %2207 = vsyncpa [#allocation9], 1 }
 0x4c5   :  { %2208 = vsyncpa [#allocation7], 1 }

</bundles_post_ra>
